<compile_context>
chip_gen: v7x
topology: tpu7x:2x2x1
jax: 0.10.0
libtpu: 0.0.40
codegen_flags: <defaults>
</compile_context>

<pallas_src>
import jax
import jax.numpy as jnp
from jax import lax
from jax.experimental import pallas as pl
from jax.experimental.pallas import tpu as pltpu


# ---------------------------------------------------------------------------
# Fused Pallas kernel
# ---------------------------------------------------------------------------
def _make_bottleneck_kernel(H, W, P, B_img):
    hw = H * W

    def kernel(x_ref, w1_ref, b1_ref, w2_ref, b2_ref, w3_ref, b3_ref,
               o_ref, acc_ref):
        # Grid-invariant operands: load once, reuse for every image.
        w1 = w1_ref[...]          # (Cin, P)   bf16, BN1 scale folded
        b1 = b1_ref[...]          # (1, P)     f32
        w2 = w2_ref[...]          # (P, 9P)    bf16, BN2 scale folded, tap-major
        b2 = b2_ref[...]          # (1, P)     f32
        w3 = w3_ref[...]          # (P, Cout)  bf16, BN3 scale folded
        b3 = b3_ref[...]          # (1, Cout)  f32

        # Column masks for taps that read across the left/right image edge in
        # the flat (h*W + w) row layout.  iota + compare: cheap VPU filler.
        col = lax.broadcasted_iota(jnp.int32, (hw, 1), 0) % W
        not_left = (col != 0).astype(jnp.float32)        # invalid when w == 0
        not_right = (col != W - 1).astype(jnp.float32)   # invalid when w == W-1

        for b in range(B_img):
            xb = x_ref[b]                                  # (hw, Cin) bf16

            # ---- conv1 (1x1) + bn1 + relu (scale folded into w1)
            t1 = jnp.dot(xb, w1, preferred_element_type=jnp.float32)
            t1 = jnp.maximum(t1 + b1, 0.0).astype(jnp.bfloat16)      # (hw, P)

            # ---- conv2 (3x3, pad=1): one lane-dense matmul over all 9 taps
            u = jnp.dot(t1, w2, preferred_element_type=jnp.float32)  # (hw, 9P)

            # Center tap (kh=kw=1, shift 0) initializes the accumulator; the
            # bn2 bias is folded into the init.
            acc_ref[...] = u[:, 4 * P:5 * P] + b2
            for kh in range(3):
                for kw in range(3):
                    if kh == 1 and kw == 1:
                        continue
                    tap = kh * 3 + kw
                    d = (kh - 1) * W + (kw - 1)           # row shift into u
                    lo, hi = max(0, -d), hw - max(0, d)   # valid output rows
                    if hi <= lo:
                        continue
                    contrib = u[lo + d:hi + d, tap * P:(tap + 1) * P]
                    if kw == 0:      # reads across the left image edge
                        contrib = contrib * not_left[lo:hi]
                    elif kw == 2:    # reads across the right image edge
                        contrib = contrib * not_right[lo:hi]
                    acc_ref[lo:hi, :] = acc_ref[lo:hi, :] + contrib

            # bn2 bias already applied; relu
            t2 = jnp.maximum(acc_ref[...], 0.0).astype(jnp.bfloat16)  # (hw, P)

            # ---- conv3 (1x1) + bn3 + residual + relu (residual = input block)
            y = jnp.dot(t2, w3, preferred_element_type=jnp.float32)   # (hw, Cout)
            o_ref[b] = jnp.maximum(y + b3 + xb.astype(jnp.float32), 0.0)

    return kernel


# ---------------------------------------------------------------------------
# NHWC core wrapper (lane-dense, no host pad / slice passes)
# ---------------------------------------------------------------------------
def bottleneck_forward_nhwc(x_nhwc, params, stride=1, eps=1e-5):
    N, H, W, Cin = (int(d) for d in x_nhwc.shape)
    w1, w2, w3 = params["w1"], params["w2"], params["w3"]     # OIHW
    P = int(w1.shape[0])
    Cout = int(w3.shape[0])
    if stride != 1 or Cin != Cout:
        # TODO(synk): stride>1 / downsample branch not implemented; this module
        # instance (downsample=None) requires stride==1 and Cin == 4*planes.
        raise NotImplementedError("only stride=1, downsample=None is supported")

    def scale_bias(gbmv):
        g, b, m, v = gbmv
        s = (g / jnp.sqrt(v + eps)).astype(jnp.float32)
        return s, (b - m * s).reshape(1, -1).astype(jnp.float32)

    s1, b1 = scale_bias(params["bn1"])
    s2, b2 = scale_bias(params["bn2"])
    s3, b3 = scale_bias(params["bn3"])

    # Fold BN scales into the conv weights (f32 fold, then bf16 for the MXU).
    w1_mat = (jnp.transpose(w1[:, :, 0, 0], (1, 0)) * s1[None, :]).astype(jnp.bfloat16)   # (Cin, P)
    w2_taps = [jnp.transpose(w2[:, :, kh, kw], (1, 0)) * s2[None, :]
               for kh in range(3) for kw in range(3)]
    w2_pack = jnp.concatenate(w2_taps, axis=1).astype(jnp.bfloat16)                       # (P, 9P)
    w3_mat = (jnp.transpose(w3[:, :, 0, 0], (1, 0)) * s3[None, :]).astype(jnp.bfloat16)   # (P, Cout)

    hw = H * W
    x_flat = x_nhwc.reshape(N, hw, Cin)
    if x_flat.dtype != jnp.bfloat16:
        x_flat = x_flat.astype(jnp.bfloat16)

    # Images per grid step: big enough to amortize per-step overhead on the
    # single-core v5e/v6e, small enough to double-buffer on every generation.
    per_img = hw * Cin * 2 + hw * Cout * 4          # bf16 in + f32 out
    B_img = 1
    for d in range(1, N + 1):
        if N % d == 0 and 2 * d * per_img <= (8 << 20):
            B_img = d

    kernel = _make_bottleneck_kernel(H, W, P, B_img)

    # Raise the scoped-VMEM limit only when real shapes need it (v5e default
    # is 16 MiB); cap well below v7x's 64 MiB physical VMEM.
    weight_bytes = (w1_mat.size + w2_pack.size + w3_mat.size) * 2 \
        + (b1.size + b2.size + b3.size) * 4
    vmem_est = 2 * B_img * per_img + weight_bytes + hw * 9 * P * 4 + hw * P * 4 + (2 << 20)
    vmem_limit = int(min(vmem_est * 3 // 2, 56 << 20)) if vmem_est > (12 << 20) else None

    out_flat = pl.pallas_call(
        kernel,
        out_shape=jax.ShapeDtypeStruct((N, hw, Cout), jnp.float32),
        grid=(N // B_img,),
        in_specs=[
            pl.BlockSpec((B_img, hw, Cin), lambda i: (i, 0, 0)),   # x (also residual)
            pl.BlockSpec((Cin, P), lambda i: (0, 0)),              # w1 * s1
            pl.BlockSpec((1, P), lambda i: (0, 0)),                # b1
            pl.BlockSpec((P, 9 * P), lambda i: (0, 0)),            # w2 packed * s2
            pl.BlockSpec((1, P), lambda i: (0, 0)),                # b2
            pl.BlockSpec((P, Cout), lambda i: (0, 0)),             # w3 * s3
            pl.BlockSpec((1, Cout), lambda i: (0, 0)),             # b3
        ],
        out_specs=pl.BlockSpec((B_img, hw, Cout), lambda i: (i, 0, 0)),
        scratch_shapes=[pltpu.VMEM((hw, P), jnp.float32)],
        compiler_params=pltpu.CompilerParams(
            dimension_semantics=("parallel",),
            vmem_limit_bytes=vmem_limit),
    )(x_flat, w1_mat, b1, w2_pack, b2, w3_mat, b3)

    return out_flat.reshape(N, H, W, Cout)


# ---------------------------------------------------------------------------
# NCHW convenience wrapper (matches the PyTorch module's layout)
# ---------------------------------------------------------------------------
def bottleneck_forward(x_nchw, params, stride=1):
    x_nhwc = jnp.transpose(x_nchw, (0, 2, 3, 1))
    out_nhwc = bottleneck_forward_nhwc(x_nhwc, params, stride=stride)
    return jnp.transpose(out_nhwc, (0, 3, 1, 2))


# ---------------------------------------------------------------------------
# Pure-JAX reference (mirrors the PyTorch forward, eval-mode BN)
# ---------------------------------------------------------------------------
def reference_forward(x, params, stride=1, eps=1e-5):
    def bn(y, g, b, m, v):
        g, b, m, v = (a.reshape(1, -1, 1, 1) for a in (g, b, m, v))
        return (y - m) / jnp.sqrt(v + eps) * g + b

    dn = ("NCHW", "OIHW", "NCHW")
    hp = lax.Precision.HIGHEST
    out = lax.conv_general_dilated(x, params["w1"], (1, 1), [(0, 0), (0, 0)],
                                   dimension_numbers=dn, precision=hp)
    out = jax.nn.relu(bn(out, *params["bn1"]))
    out = lax.conv_general_dilated(out, params["w2"], (stride, stride),
                                   [(1, 1), (1, 1)],
                                   dimension_numbers=dn, precision=hp)
    out = jax.nn.relu(bn(out, *params["bn2"]))
    out = lax.conv_general_dilated(out, params["w3"], (1, 1), [(0, 0), (0, 0)],
                                   dimension_numbers=dn, precision=hp)
    out = bn(out, *params["bn3"])
    out = out + x
    return jax.nn.relu(out)


if __name__ == "__main__":
    # Bottleneck(inplanes=128, planes=32, stride=1, downsample=None)
    inplanes, planes = 128, 32
    N, H, W = 2, 8, 8

    key = jax.random.PRNGKey(0)
    ks = jax.random.split(key, 8)

    def bn_params(k, c):
        k1, k2, k3, k4 = jax.random.split(k, 4)
        gamma = 1.0 + 0.1 * jax.random.normal(k1, (c,), jnp.float32)
        beta = 0.1 * jax.random.normal(k2, (c,), jnp.float32)
        mean = 0.1 * jax.random.normal(k3, (c,), jnp.float32)
        var = 0.9 + 0.1 * jnp.abs(jax.random.normal(k4, (c,), jnp.float32))
        return gamma, beta, mean, var

    params = {
        "w1": 0.05 * jax.random.normal(ks[0], (planes, inplanes, 1, 1), jnp.float32),
        "w2": 0.05 * jax.random.normal(ks[1], (planes, planes, 3, 3), jnp.float32),
        "w3": 0.05 * jax.random.normal(ks[2], (planes * 4, planes, 1, 1), jnp.float32),
        "bn1": bn_params(ks[3], planes),
        "bn2": bn_params(ks[4], planes),
        "bn3": bn_params(ks[5], planes * 4),
    }
    x = jax.random.normal(ks[6], (N, inplanes, H, W), jnp.float32)

    out = jax.block_until_ready(bottleneck_forward(x, params, stride=1))
    ref = jax.block_until_ready(reference_forward(x, params, stride=1))

    assert out.shape == (N, planes * 4, H, W), out.shape
    err = float(jnp.max(jnp.abs(out - ref)))
    assert err < 5e-2, f"max abs error too large: {err}"
    print("KERNEL_OK")
</pallas_src>

<mosaic_0001>
module attributes {stable_mosaic.version = 11 : i64} {
  func.func @kernel(%arg0: i32, %arg1: memref<2x64x128xbf16, #tpu.memory_space<vmem>>, %arg2: memref<128x32xbf16, #tpu.memory_space<vmem>>, %arg3: memref<1x32xf32, #tpu.memory_space<vmem>>, %arg4: memref<32x288xbf16, #tpu.memory_space<vmem>>, %arg5: memref<1x32xf32, #tpu.memory_space<vmem>>, %arg6: memref<32x128xbf16, #tpu.memory_space<vmem>>, %arg7: memref<1x128xf32, #tpu.memory_space<vmem>>, %arg8: memref<2x64x128xf32, #tpu.memory_space<vmem>>, %arg9: memref<64x32xf32, #tpu.memory_space<vmem>>) attributes {dimension_semantics = [#tpu.dimension_semantics<parallel>], iteration_bounds = array<i64: 1>, scalar_prefetch = 0 : i64, scratch_operands = 1 : i64, tpu.core_type = #tpu.core_type<tc>, window_params = [{transform_indices = @transform_0, window_bounds = array<i64: 2, 64, 128>}, {pipeline_mode = #tpu.pipeline_mode<synchronous>, transform_indices = @transform_1, window_bounds = array<i64: 128, 32>}, {pipeline_mode = #tpu.pipeline_mode<synchronous>, transform_indices = @transform_2, window_bounds = array<i64: 1, 32>}, {pipeline_mode = #tpu.pipeline_mode<synchronous>, transform_indices = @transform_3, window_bounds = array<i64: 32, 288>}, {pipeline_mode = #tpu.pipeline_mode<synchronous>, transform_indices = @transform_4, window_bounds = array<i64: 1, 32>}, {pipeline_mode = #tpu.pipeline_mode<synchronous>, transform_indices = @transform_5, window_bounds = array<i64: 32, 128>}, {pipeline_mode = #tpu.pipeline_mode<synchronous>, transform_indices = @transform_6, window_bounds = array<i64: 1, 128>}, {transform_indices = @transform_7, window_bounds = array<i64: 2, 64, 128>}]} {
    %c0 = arith.constant 0 : index
    %c0_0 = arith.constant 0 : index
    %0 = vector.load %arg2[%c0, %c0_0] : memref<128x32xbf16, #tpu.memory_space<vmem>>, vector<128x32xbf16>
    %c0_1 = arith.constant 0 : index
    %c0_2 = arith.constant 0 : index
    %1 = vector.load %arg3[%c0_1, %c0_2] : memref<1x32xf32, #tpu.memory_space<vmem>>, vector<1x32xf32>
    %c0_3 = arith.constant 0 : index
    %c0_4 = arith.constant 0 : index
    %2 = vector.load %arg4[%c0_3, %c0_4] : memref<32x288xbf16, #tpu.memory_space<vmem>>, vector<32x288xbf16>
    %c0_5 = arith.constant 0 : index
    %c0_6 = arith.constant 0 : index
    %3 = vector.load %arg5[%c0_5, %c0_6] : memref<1x32xf32, #tpu.memory_space<vmem>>, vector<1x32xf32>
    %c0_7 = arith.constant 0 : index
    %c0_8 = arith.constant 0 : index
    %4 = vector.load %arg6[%c0_7, %c0_8] : memref<32x128xbf16, #tpu.memory_space<vmem>>, vector<32x128xbf16>
    %c0_9 = arith.constant 0 : index
    %c0_10 = arith.constant 0 : index
    %5 = vector.load %arg7[%c0_9, %c0_10] : memref<1x128xf32, #tpu.memory_space<vmem>>, vector<1x128xf32>
    %6 = tpu.iota {dimensions = array<i32: 0>} : vector<64x1xi32>
    %c8_i32 = arith.constant 8 : i32
    %c0_i32 = arith.constant 0 : i32
    %7 = arith.cmpi eq, %c8_i32, %c0_i32 : i32
    %c1_i32 = arith.constant 1 : i32
    %8 = arith.select %7, %c1_i32, %c8_i32 : i32
    %9 = vector.broadcast %8 : i32 to vector<64x1xi32>
    %10 = arith.remsi %6, %9 : vector<64x1xi32>
    %c0_i32_11 = arith.constant 0 : i32
    %11 = vector.broadcast %c0_i32_11 : i32 to vector<64x1xi32>
    %12 = arith.cmpi ne, %10, %11 : vector<64x1xi32>
    %c0_i32_12 = arith.constant 0 : i32
    %13 = vector.broadcast %c0_i32_12 : i32 to vector<64x1xi32>
    %14 = arith.cmpi slt, %10, %13 : vector<64x1xi32>
    %c0_i32_13 = arith.constant 0 : i32
    %15 = arith.cmpi slt, %8, %c0_i32_13 : i32
    %16 = vector.broadcast %15 : i1 to vector<64x1xi1>
    %17 = vector.broadcast %16 : vector<64x1xi1> to vector<64x1xi1>
    %18 = arith.xori %14, %17 : vector<64x1xi1>
    %19 = arith.andi %18, %12 : vector<64x1xi1>
    %20 = vector.broadcast %8 : i32 to vector<64x1xi32>
    %21 = arith.addi %10, %20 : vector<64x1xi32>
    %22 = arith.select %19, %21, %10 : vector<64x1xi1>, vector<64x1xi32>
    %c0_i32_14 = arith.constant 0 : i32
    %23 = vector.broadcast %c0_i32_14 : i32 to vector<64x1xi32>
    %24 = arith.cmpi ne, %22, %23 : vector<64x1xi32>
    %25 = arith.extui %24 : vector<64x1xi1> to vector<64x1xi32>
    %26 = arith.sitofp %25 : vector<64x1xi32> to vector<64x1xf32>
    %c7_i32 = arith.constant 7 : i32
    %27 = vector.broadcast %c7_i32 : i32 to vector<64x1xi32>
    %28 = arith.cmpi ne, %22, %27 : vector<64x1xi32>
    %29 = arith.extui %28 : vector<64x1xi1> to vector<64x1xi32>
    %30 = arith.sitofp %29 : vector<64x1xi32> to vector<64x1xf32>
    %c0_15 = arith.constant 0 : index
    %c0_16 = arith.constant 0 : index
    %c0_17 = arith.constant 0 : index
    %31 = vector.load %arg1[%c0_15, %c0_16, %c0_17] : memref<2x64x128xbf16, #tpu.memory_space<vmem>>, vector<1x64x128xbf16>
    %32 = vector.shape_cast %31 : vector<1x64x128xbf16> to vector<64x128xbf16>
    %cst = arith.constant dense<0.000000e+00> : vector<64x32xf32>
    %33 = tpu.matmul %32, %0, %cst {dimension_numbers = #tpu.dot_dimension_numbers<[1], [0], [0], [1], [0, 0, 1, 1], [], []>} : vector<64x128xbf16>, vector<128x32xbf16>, vector<64x32xf32> -> vector<64x32xf32>
    %34 = vector.broadcast %1 : vector<1x32xf32> to vector<64x32xf32>
    %35 = arith.addf %33, %34 : vector<64x32xf32>
    %cst_18 = arith.constant 0.000000e+00 : f32
    %36 = vector.broadcast %cst_18 : f32 to vector<64x32xf32>
    %37 = arith.maximumf %35, %36 : vector<64x32xf32>
    %38 = arith.truncf %37 : vector<64x32xf32> to vector<64x32xbf16>
    %cst_19 = arith.constant dense<0.000000e+00> : vector<64x288xf32>
    %39 = tpu.matmul %38, %2, %cst_19 {dimension_numbers = #tpu.dot_dimension_numbers<[1], [0], [0], [1], [0, 0, 1, 1], [], []>} : vector<64x32xbf16>, vector<32x288xbf16>, vector<64x288xf32> -> vector<64x288xf32>
    %40 = vector.extract_strided_slice %39 {offsets = [0, 128], sizes = [64, 32], strides = [1, 1]} : vector<64x288xf32> to vector<64x32xf32>
    %41 = vector.broadcast %3 : vector<1x32xf32> to vector<64x32xf32>
    %42 = arith.addf %40, %41 : vector<64x32xf32>
    %c0_20 = arith.constant 0 : index
    %c0_21 = arith.constant 0 : index
    %43 = vector.load %arg9[%c0_20, %c0_21] : memref<64x32xf32, #tpu.memory_space<vmem>>, vector<64x32xf32>
    tpu.vector_store %arg9[%c0_20, %c0_21], %42 {strides = array<i32>} : memref<64x32xf32, #tpu.memory_space<vmem>>, vector<64x32xf32>,
    %44 = vector.extract_strided_slice %39 {offsets = [0, 0], sizes = [55, 32], strides = [1, 1]} : vector<64x288xf32> to vector<55x32xf32>
    %45 = vector.extract_strided_slice %26 {offsets = [9, 0], sizes = [55, 1], strides = [1, 1]} : vector<64x1xf32> to vector<55x1xf32>
    %46 = vector.broadcast %45 : vector<55x1xf32> to vector<55x32xf32>
    %47 = arith.mulf %44, %46 : vector<55x32xf32>
    %c9 = arith.constant 9 : index
    %c0_22 = arith.constant 0 : index
    %48 = vector.load %arg9[%c9, %c0_22] : memref<64x32xf32, #tpu.memory_space<vmem>>, vector<55x32xf32>
    %49 = arith.addf %48, %47 : vector<55x32xf32>
    %c9_23 = arith.constant 9 : index
    %c0_24 = arith.constant 0 : index
    %50 = vector.load %arg9[%c9_23, %c0_24] : memref<64x32xf32, #tpu.memory_space<vmem>>, vector<55x32xf32>
    tpu.vector_store %arg9[%c9_23, %c0_24], %49 {strides = array<i32>} : memref<64x32xf32, #tpu.memory_space<vmem>>, vector<55x32xf32>,
    %51 = vector.extract_strided_slice %39 {offsets = [0, 32], sizes = [56, 32], strides = [1, 1]} : vector<64x288xf32> to vector<56x32xf32>
    %c8 = arith.constant 8 : index
    %c0_25 = arith.constant 0 : index
    %52 = vector.load %arg9[%c8, %c0_25] : memref<64x32xf32, #tpu.memory_space<vmem>>, vector<56x32xf32>
    %53 = arith.addf %52, %51 : vector<56x32xf32>
    %c8_26 = arith.constant 8 : index
    %c0_27 = arith.constant 0 : index
    %54 = vector.load %arg9[%c8_26, %c0_27] : memref<64x32xf32, #tpu.memory_space<vmem>>, vector<56x32xf32>
    tpu.vector_store %arg9[%c8_26, %c0_27], %53 {strides = array<i32>} : memref<64x32xf32, #tpu.memory_space<vmem>>, vector<56x32xf32>,
    %55 = vector.extract_strided_slice %39 {offsets = [0, 64], sizes = [57, 32], strides = [1, 1]} : vector<64x288xf32> to vector<57x32xf32>
    %56 = vector.extract_strided_slice %30 {offsets = [7, 0], sizes = [57, 1], strides = [1, 1]} : vector<64x1xf32> to vector<57x1xf32>
    %57 = vector.broadcast %56 : vector<57x1xf32> to vector<57x32xf32>
    %58 = arith.mulf %55, %57 : vector<57x32xf32>
    %c7 = arith.constant 7 : index
    %c0_28 = arith.constant 0 : index
    %59 = vector.load %arg9[%c7, %c0_28] : memref<64x32xf32, #tpu.memory_space<vmem>>, vector<57x32xf32>
    %60 = arith.addf %59, %58 : vector<57x32xf32>
    %c7_29 = arith.constant 7 : index
    %c0_30 = arith.constant 0 : index
    %61 = vector.load %arg9[%c7_29, %c0_30] : memref<64x32xf32, #tpu.memory_space<vmem>>, vector<57x32xf32>
    tpu.vector_store %arg9[%c7_29, %c0_30], %60 {strides = array<i32>} : memref<64x32xf32, #tpu.memory_space<vmem>>, vector<57x32xf32>,
    %62 = vector.extract_strided_slice %39 {offsets = [0, 96], sizes = [63, 32], strides = [1, 1]} : vector<64x288xf32> to vector<63x32xf32>
    %63 = vector.extract_strided_slice %26 {offsets = [1, 0], sizes = [63, 1], strides = [1, 1]} : vector<64x1xf32> to vector<63x1xf32>
    %64 = vector.broadcast %63 : vector<63x1xf32> to vector<63x32xf32>
    %65 = arith.mulf %62, %64 : vector<63x32xf32>
    %c1 = arith.constant 1 : index
    %c0_31 = arith.constant 0 : index
    %66 = vector.load %arg9[%c1, %c0_31] : memref<64x32xf32, #tpu.memory_space<vmem>>, vector<63x32xf32>
    %67 = arith.addf %66, %65 : vector<63x32xf32>
    %c1_32 = arith.constant 1 : index
    %c0_33 = arith.constant 0 : index
    %68 = vector.load %arg9[%c1_32, %c0_33] : memref<64x32xf32, #tpu.memory_space<vmem>>, vector<63x32xf32>
    tpu.vector_store %arg9[%c1_32, %c0_33], %67 {strides = array<i32>} : memref<64x32xf32, #tpu.memory_space<vmem>>, vector<63x32xf32>,
    %69 = vector.extract_strided_slice %39 {offsets = [1, 160], sizes = [63, 32], strides = [1, 1]} : vector<64x288xf32> to vector<63x32xf32>
    %70 = vector.extract_strided_slice %30 {offsets = [0, 0], sizes = [63, 1], strides = [1, 1]} : vector<64x1xf32> to vector<63x1xf32>
    %71 = vector.broadcast %70 : vector<63x1xf32> to vector<63x32xf32>
    %72 = arith.mulf %69, %71 : vector<63x32xf32>
    %c0_34 = arith.constant 0 : index
    %c0_35 = arith.constant 0 : index
    %73 = vector.load %arg9[%c0_34, %c0_35] : memref<64x32xf32, #tpu.memory_space<vmem>>, vector<63x32xf32>
    %74 = arith.addf %73, %72 : vector<63x32xf32>
    %c0_36 = arith.constant 0 : index
    %c0_37 = arith.constant 0 : index
    %75 = vector.load %arg9[%c0_36, %c0_37] : memref<64x32xf32, #tpu.memory_space<vmem>>, vector<63x32xf32>
    tpu.vector_store %arg9[%c0_36, %c0_37], %74 {strides = array<i32>} : memref<64x32xf32, #tpu.memory_space<vmem>>, vector<63x32xf32>,
    %76 = vector.extract_strided_slice %39 {offsets = [7, 192], sizes = [57, 32], strides = [1, 1]} : vector<64x288xf32> to vector<57x32xf32>
    %77 = vector.extract_strided_slice %26 {offsets = [0, 0], sizes = [57, 1], strides = [1, 1]} : vector<64x1xf32> to vector<57x1xf32>
    %78 = vector.broadcast %77 : vector<57x1xf32> to vector<57x32xf32>
    %79 = arith.mulf %76, %78 : vector<57x32xf32>
    %c0_38 = arith.constant 0 : index
    %c0_39 = arith.constant 0 : index
    %80 = vector.load %arg9[%c0_38, %c0_39] : memref<64x32xf32, #tpu.memory_space<vmem>>, vector<57x32xf32>
    %81 = arith.addf %80, %79 : vector<57x32xf32>
    %c0_40 = arith.constant 0 : index
    %c0_41 = arith.constant 0 : index
    %82 = vector.load %arg9[%c0_40, %c0_41] : memref<64x32xf32, #tpu.memory_space<vmem>>, vector<57x32xf32>
    tpu.vector_store %arg9[%c0_40, %c0_41], %81 {strides = array<i32>} : memref<64x32xf32, #tpu.memory_space<vmem>>, vector<57x32xf32>,
    %83 = vector.extract_strided_slice %39 {offsets = [8, 224], sizes = [56, 32], strides = [1, 1]} : vector<64x288xf32> to vector<56x32xf32>
    %c0_42 = arith.constant 0 : index
    %c0_43 = arith.constant 0 : index
    %84 = vector.load %arg9[%c0_42, %c0_43] : memref<64x32xf32, #tpu.memory_space<vmem>>, vector<56x32xf32>
    %85 = arith.addf %84, %83 : vector<56x32xf32>
    %c0_44 = arith.constant 0 : index
    %c0_45 = arith.constant 0 : index
    %86 = vector.load %arg9[%c0_44, %c0_45] : memref<64x32xf32, #tpu.memory_space<vmem>>, vector<56x32xf32>
    tpu.vector_store %arg9[%c0_44, %c0_45], %85 {strides = array<i32>} : memref<64x32xf32, #tpu.memory_space<vmem>>, vector<56x32xf32>,
    %87 = vector.extract_strided_slice %39 {offsets = [9, 256], sizes = [55, 32], strides = [1, 1]} : vector<64x288xf32> to vector<55x32xf32>
    %88 = vector.extract_strided_slice %30 {offsets = [0, 0], sizes = [55, 1], strides = [1, 1]} : vector<64x1xf32> to vector<55x1xf32>
    %89 = vector.broadcast %88 : vector<55x1xf32> to vector<55x32xf32>
    %90 = arith.mulf %87, %89 : vector<55x32xf32>
    %c0_46 = arith.constant 0 : index
    %c0_47 = arith.constant 0 : index
    %91 = vector.load %arg9[%c0_46, %c0_47] : memref<64x32xf32, #tpu.memory_space<vmem>>, vector<55x32xf32>
    %92 = arith.addf %91, %90 : vector<55x32xf32>
    %c0_48 = arith.constant 0 : index
    %c0_49 = arith.constant 0 : index
    %93 = vector.load %arg9[%c0_48, %c0_49] : memref<64x32xf32, #tpu.memory_space<vmem>>, vector<55x32xf32>
    tpu.vector_store %arg9[%c0_48, %c0_49], %92 {strides = array<i32>} : memref<64x32xf32, #tpu.memory_space<vmem>>, vector<55x32xf32>,
    %c0_50 = arith.constant 0 : index
    %c0_51 = arith.constant 0 : index
    %94 = vector.load %arg9[%c0_50, %c0_51] : memref<64x32xf32, #tpu.memory_space<vmem>>, vector<64x32xf32>
    %cst_52 = arith.constant 0.000000e+00 : f32
    %95 = vector.broadcast %cst_52 : f32 to vector<64x32xf32>
    %96 = arith.maximumf %94, %95 : vector<64x32xf32>
    %97 = arith.truncf %96 : vector<64x32xf32> to vector<64x32xbf16>
    %cst_53 = arith.constant dense<0.000000e+00> : vector<64x128xf32>
    %98 = tpu.matmul %97, %4, %cst_53 {dimension_numbers = #tpu.dot_dimension_numbers<[1], [0], [0], [1], [0, 0, 1, 1], [], []>} : vector<64x32xbf16>, vector<32x128xbf16>, vector<64x128xf32> -> vector<64x128xf32>
    %99 = vector.broadcast %5 : vector<1x128xf32> to vector<64x128xf32>
    %100 = arith.addf %98, %99 : vector<64x128xf32>
    %101 = arith.extf %32 : vector<64x128xbf16> to vector<64x128xf32>
    %102 = arith.addf %100, %101 : vector<64x128xf32>
    %cst_54 = arith.constant 0.000000e+00 : f32
    %103 = vector.broadcast %cst_54 : f32 to vector<64x128xf32>
    %104 = arith.maximumf %102, %103 : vector<64x128xf32>
    %c0_55 = arith.constant 0 : index
    %c0_56 = arith.constant 0 : index
    %c0_57 = arith.constant 0 : index
    %105 = vector.load %arg8[%c0_55, %c0_56, %c0_57] : memref<2x64x128xf32, #tpu.memory_space<vmem>>, vector<1x64x128xf32>
    %106 = vector.shape_cast %105 : vector<1x64x128xf32> to vector<64x128xf32>
    %107 = vector.shape_cast %104 : vector<64x128xf32> to vector<1x64x128xf32>
    tpu.vector_store %arg8[%c0_55, %c0_56, %c0_57], %107 {strides = array<i32>} : memref<2x64x128xf32, #tpu.memory_space<vmem>>, vector<1x64x128xf32>,
    %c1_58 = arith.constant 1 : index
    %c0_59 = arith.constant 0 : index
    %c0_60 = arith.constant 0 : index
    %108 = vector.load %arg1[%c1_58, %c0_59, %c0_60] : memref<2x64x128xbf16, #tpu.memory_space<vmem>>, vector<1x64x128xbf16>
    %109 = vector.shape_cast %108 : vector<1x64x128xbf16> to vector<64x128xbf16>
    %cst_61 = arith.constant dense<0.000000e+00> : vector<64x32xf32>
    %110 = tpu.matmul %109, %0, %cst_61 {dimension_numbers = #tpu.dot_dimension_numbers<[1], [0], [0], [1], [0, 0, 1, 1], [], []>} : vector<64x128xbf16>, vector<128x32xbf16>, vector<64x32xf32> -> vector<64x32xf32>
    %111 = vector.broadcast %1 : vector<1x32xf32> to vector<64x32xf32>
    %112 = arith.addf %110, %111 : vector<64x32xf32>
    %cst_62 = arith.constant 0.000000e+00 : f32
    %113 = vector.broadcast %cst_62 : f32 to vector<64x32xf32>
    %114 = arith.maximumf %112, %113 : vector<64x32xf32>
    %115 = arith.truncf %114 : vector<64x32xf32> to vector<64x32xbf16>
    %cst_63 = arith.constant dense<0.000000e+00> : vector<64x288xf32>
    %116 = tpu.matmul %115, %2, %cst_63 {dimension_numbers = #tpu.dot_dimension_numbers<[1], [0], [0], [1], [0, 0, 1, 1], [], []>} : vector<64x32xbf16>, vector<32x288xbf16>, vector<64x288xf32> -> vector<64x288xf32>
    %117 = vector.extract_strided_slice %116 {offsets = [0, 128], sizes = [64, 32], strides = [1, 1]} : vector<64x288xf32> to vector<64x32xf32>
    %118 = vector.broadcast %3 : vector<1x32xf32> to vector<64x32xf32>
    %119 = arith.addf %117, %118 : vector<64x32xf32>
    %c0_64 = arith.constant 0 : index
    %c0_65 = arith.constant 0 : index
    %120 = vector.load %arg9[%c0_64, %c0_65] : memref<64x32xf32, #tpu.memory_space<vmem>>, vector<64x32xf32>
    tpu.vector_store %arg9[%c0_64, %c0_65], %119 {strides = array<i32>} : memref<64x32xf32, #tpu.memory_space<vmem>>, vector<64x32xf32>,
    %121 = vector.extract_strided_slice %116 {offsets = [0, 0], sizes = [55, 32], strides = [1, 1]} : vector<64x288xf32> to vector<55x32xf32>
    %122 = vector.extract_strided_slice %26 {offsets = [9, 0], sizes = [55, 1], strides = [1, 1]} : vector<64x1xf32> to vector<55x1xf32>
    %123 = vector.broadcast %122 : vector<55x1xf32> to vector<55x32xf32>
    %124 = arith.mulf %121, %123 : vector<55x32xf32>
    %c9_66 = arith.constant 9 : index
    %c0_67 = arith.constant 0 : index
    %125 = vector.load %arg9[%c9_66, %c0_67] : memref<64x32xf32, #tpu.memory_space<vmem>>, vector<55x32xf32>
    %126 = arith.addf %125, %124 : vector<55x32xf32>
    %c9_68 = arith.constant 9 : index
    %c0_69 = arith.constant 0 : index
    %127 = vector.load %arg9[%c9_68, %c0_69] : memref<64x32xf32, #tpu.memory_space<vmem>>, vector<55x32xf32>
    tpu.vector_store %arg9[%c9_68, %c0_69], %126 {strides = array<i32>} : memref<64x32xf32, #tpu.memory_space<vmem>>, vector<55x32xf32>,
    %128 = vector.extract_strided_slice %116 {offsets = [0, 32], sizes = [56, 32], strides = [1, 1]} : vector<64x288xf32> to vector<56x32xf32>
    %c8_70 = arith.constant 8 : index
    %c0_71 = arith.constant 0 : index
    %129 = vector.load %arg9[%c8_70, %c0_71] : memref<64x32xf32, #tpu.memory_space<vmem>>, vector<56x32xf32>
    %130 = arith.addf %129, %128 : vector<56x32xf32>
    %c8_72 = arith.constant 8 : index
    %c0_73 = arith.constant 0 : index
    %131 = vector.load %arg9[%c8_72, %c0_73] : memref<64x32xf32, #tpu.memory_space<vmem>>, vector<56x32xf32>
    tpu.vector_store %arg9[%c8_72, %c0_73], %130 {strides = array<i32>} : memref<64x32xf32, #tpu.memory_space<vmem>>, vector<56x32xf32>,
    %132 = vector.extract_strided_slice %116 {offsets = [0, 64], sizes = [57, 32], strides = [1, 1]} : vector<64x288xf32> to vector<57x32xf32>
    %133 = vector.extract_strided_slice %30 {offsets = [7, 0], sizes = [57, 1], strides = [1, 1]} : vector<64x1xf32> to vector<57x1xf32>
    %134 = vector.broadcast %133 : vector<57x1xf32> to vector<57x32xf32>
    %135 = arith.mulf %132, %134 : vector<57x32xf32>
    %c7_74 = arith.constant 7 : index
    %c0_75 = arith.constant 0 : index
    %136 = vector.load %arg9[%c7_74, %c0_75] : memref<64x32xf32, #tpu.memory_space<vmem>>, vector<57x32xf32>
    %137 = arith.addf %136, %135 : vector<57x32xf32>
    %c7_76 = arith.constant 7 : index
    %c0_77 = arith.constant 0 : index
    %138 = vector.load %arg9[%c7_76, %c0_77] : memref<64x32xf32, #tpu.memory_space<vmem>>, vector<57x32xf32>
    tpu.vector_store %arg9[%c7_76, %c0_77], %137 {strides = array<i32>} : memref<64x32xf32, #tpu.memory_space<vmem>>, vector<57x32xf32>,
    %139 = vector.extract_strided_slice %116 {offsets = [0, 96], sizes = [63, 32], strides = [1, 1]} : vector<64x288xf32> to vector<63x32xf32>
    %140 = vector.extract_strided_slice %26 {offsets = [1, 0], sizes = [63, 1], strides = [1, 1]} : vector<64x1xf32> to vector<63x1xf32>
    %141 = vector.broadcast %140 : vector<63x1xf32> to vector<63x32xf32>
    %142 = arith.mulf %139, %141 : vector<63x32xf32>
    %c1_78 = arith.constant 1 : index
    %c0_79 = arith.constant 0 : index
    %143 = vector.load %arg9[%c1_78, %c0_79] : memref<64x32xf32, #tpu.memory_space<vmem>>, vector<63x32xf32>
    %144 = arith.addf %143, %142 : vector<63x32xf32>
    %c1_80 = arith.constant 1 : index
    %c0_81 = arith.constant 0 : index
    %145 = vector.load %arg9[%c1_80, %c0_81] : memref<64x32xf32, #tpu.memory_space<vmem>>, vector<63x32xf32>
    tpu.vector_store %arg9[%c1_80, %c0_81], %144 {strides = array<i32>} : memref<64x32xf32, #tpu.memory_space<vmem>>, vector<63x32xf32>,
    %146 = vector.extract_strided_slice %116 {offsets = [1, 160], sizes = [63, 32], strides = [1, 1]} : vector<64x288xf32> to vector<63x32xf32>
    %147 = vector.extract_strided_slice %30 {offsets = [0, 0], sizes = [63, 1], strides = [1, 1]} : vector<64x1xf32> to vector<63x1xf32>
    %148 = vector.broadcast %147 : vector<63x1xf32> to vector<63x32xf32>
    %149 = arith.mulf %146, %148 : vector<63x32xf32>
    %c0_82 = arith.constant 0 : index
    %c0_83 = arith.constant 0 : index
    %150 = vector.load %arg9[%c0_82, %c0_83] : memref<64x32xf32, #tpu.memory_space<vmem>>, vector<63x32xf32>
    %151 = arith.addf %150, %149 : vector<63x32xf32>
    %c0_84 = arith.constant 0 : index
    %c0_85 = arith.constant 0 : index
    %152 = vector.load %arg9[%c0_84, %c0_85] : memref<64x32xf32, #tpu.memory_space<vmem>>, vector<63x32xf32>
    tpu.vector_store %arg9[%c0_84, %c0_85], %151 {strides = array<i32>} : memref<64x32xf32, #tpu.memory_space<vmem>>, vector<63x32xf32>,
    %153 = vector.extract_strided_slice %116 {offsets = [7, 192], sizes = [57, 32], strides = [1, 1]} : vector<64x288xf32> to vector<57x32xf32>
    %154 = vector.extract_strided_slice %26 {offsets = [0, 0], sizes = [57, 1], strides = [1, 1]} : vector<64x1xf32> to vector<57x1xf32>
    %155 = vector.broadcast %154 : vector<57x1xf32> to vector<57x32xf32>
    %156 = arith.mulf %153, %155 : vector<57x32xf32>
    %c0_86 = arith.constant 0 : index
    %c0_87 = arith.constant 0 : index
    %157 = vector.load %arg9[%c0_86, %c0_87] : memref<64x32xf32, #tpu.memory_space<vmem>>, vector<57x32xf32>
    %158 = arith.addf %157, %156 : vector<57x32xf32>
    %c0_88 = arith.constant 0 : index
    %c0_89 = arith.constant 0 : index
    %159 = vector.load %arg9[%c0_88, %c0_89] : memref<64x32xf32, #tpu.memory_space<vmem>>, vector<57x32xf32>
    tpu.vector_store %arg9[%c0_88, %c0_89], %158 {strides = array<i32>} : memref<64x32xf32, #tpu.memory_space<vmem>>, vector<57x32xf32>,
    %160 = vector.extract_strided_slice %116 {offsets = [8, 224], sizes = [56, 32], strides = [1, 1]} : vector<64x288xf32> to vector<56x32xf32>
    %c0_90 = arith.constant 0 : index
    %c0_91 = arith.constant 0 : index
    %161 = vector.load %arg9[%c0_90, %c0_91] : memref<64x32xf32, #tpu.memory_space<vmem>>, vector<56x32xf32>
    %162 = arith.addf %161, %160 : vector<56x32xf32>
    %c0_92 = arith.constant 0 : index
    %c0_93 = arith.constant 0 : index
    %163 = vector.load %arg9[%c0_92, %c0_93] : memref<64x32xf32, #tpu.memory_space<vmem>>, vector<56x32xf32>
    tpu.vector_store %arg9[%c0_92, %c0_93], %162 {strides = array<i32>} : memref<64x32xf32, #tpu.memory_space<vmem>>, vector<56x32xf32>,
    %164 = vector.extract_strided_slice %116 {offsets = [9, 256], sizes = [55, 32], strides = [1, 1]} : vector<64x288xf32> to vector<55x32xf32>
    %165 = vector.extract_strided_slice %30 {offsets = [0, 0], sizes = [55, 1], strides = [1, 1]} : vector<64x1xf32> to vector<55x1xf32>
    %166 = vector.broadcast %165 : vector<55x1xf32> to vector<55x32xf32>
    %167 = arith.mulf %164, %166 : vector<55x32xf32>
    %c0_94 = arith.constant 0 : index
    %c0_95 = arith.constant 0 : index
    %168 = vector.load %arg9[%c0_94, %c0_95] : memref<64x32xf32, #tpu.memory_space<vmem>>, vector<55x32xf32>
    %169 = arith.addf %168, %167 : vector<55x32xf32>
    %c0_96 = arith.constant 0 : index
    %c0_97 = arith.constant 0 : index
    %170 = vector.load %arg9[%c0_96, %c0_97] : memref<64x32xf32, #tpu.memory_space<vmem>>, vector<55x32xf32>
    tpu.vector_store %arg9[%c0_96, %c0_97], %169 {strides = array<i32>} : memref<64x32xf32, #tpu.memory_space<vmem>>, vector<55x32xf32>,
    %c0_98 = arith.constant 0 : index
    %c0_99 = arith.constant 0 : index
    %171 = vector.load %arg9[%c0_98, %c0_99] : memref<64x32xf32, #tpu.memory_space<vmem>>, vector<64x32xf32>
    %cst_100 = arith.constant 0.000000e+00 : f32
    %172 = vector.broadcast %cst_100 : f32 to vector<64x32xf32>
    %173 = arith.maximumf %171, %172 : vector<64x32xf32>
    %174 = arith.truncf %173 : vector<64x32xf32> to vector<64x32xbf16>
    %cst_101 = arith.constant dense<0.000000e+00> : vector<64x128xf32>
    %175 = tpu.matmul %174, %4, %cst_101 {dimension_numbers = #tpu.dot_dimension_numbers<[1], [0], [0], [1], [0, 0, 1, 1], [], []>} : vector<64x32xbf16>, vector<32x128xbf16>, vector<64x128xf32> -> vector<64x128xf32>
    %176 = vector.broadcast %5 : vector<1x128xf32> to vector<64x128xf32>
    %177 = arith.addf %175, %176 : vector<64x128xf32>
    %178 = arith.extf %109 : vector<64x128xbf16> to vector<64x128xf32>
    %179 = arith.addf %177, %178 : vector<64x128xf32>
    %cst_102 = arith.constant 0.000000e+00 : f32
    %180 = vector.broadcast %cst_102 : f32 to vector<64x128xf32>
    %181 = arith.maximumf %179, %180 : vector<64x128xf32>
    %c1_103 = arith.constant 1 : index
    %c0_104 = arith.constant 0 : index
    %c0_105 = arith.constant 0 : index
    %182 = vector.load %arg8[%c1_103, %c0_104, %c0_105] : memref<2x64x128xf32, #tpu.memory_space<vmem>>, vector<1x64x128xf32>
    %183 = vector.shape_cast %182 : vector<1x64x128xf32> to vector<64x128xf32>
    %184 = vector.shape_cast %181 : vector<64x128xf32> to vector<1x64x128xf32>
    tpu.vector_store %arg8[%c1_103, %c0_104, %c0_105], %184 {strides = array<i32>} : memref<2x64x128xf32, #tpu.memory_space<vmem>>, vector<1x64x128xf32>,
    return
  }
  func.func @transform_0(%arg0: i32) -> (i32, i32, i32) {
    %c0_i32 = arith.constant 0 : i32
    %c0_i32_0 = arith.constant 0 : i32
    %c0_i32_1 = arith.constant 0 : i32
    return %arg0, %c0_i32, %c0_i32_0 : i32, i32, i32
  }
  func.func @transform_1(%arg0: i32) -> (i32, i32) {
    %c0_i32 = arith.constant 0 : i32
    %c0_i32_0 = arith.constant 0 : i32
    %c0_i32_1 = arith.constant 0 : i32
    return %c0_i32, %c0_i32_0 : i32, i32
  }
  func.func @transform_2(%arg0: i32) -> (i32, i32) {
    %c0_i32 = arith.constant 0 : i32
    %c0_i32_0 = arith.constant 0 : i32
    %c0_i32_1 = arith.constant 0 : i32
    return %c0_i32, %c0_i32_0 : i32, i32
  }
  func.func @transform_3(%arg0: i32) -> (i32, i32) {
    %c0_i32 = arith.constant 0 : i32
    %c0_i32_0 = arith.constant 0 : i32
    %c0_i32_1 = arith.constant 0 : i32
    return %c0_i32, %c0_i32_0 : i32, i32
  }
  func.func @transform_4(%arg0: i32) -> (i32, i32) {
    %c0_i32 = arith.constant 0 : i32
    %c0_i32_0 = arith.constant 0 : i32
    %c0_i32_1 = arith.constant 0 : i32
    return %c0_i32, %c0_i32_0 : i32, i32
  }
  func.func @transform_5(%arg0: i32) -> (i32, i32) {
    %c0_i32 = arith.constant 0 : i32
    %c0_i32_0 = arith.constant 0 : i32
    %c0_i32_1 = arith.constant 0 : i32
    return %c0_i32, %c0_i32_0 : i32, i32
  }
  func.func @transform_6(%arg0: i32) -> (i32, i32) {
    %c0_i32 = arith.constant 0 : i32
    %c0_i32_0 = arith.constant 0 : i32
    %c0_i32_1 = arith.constant 0 : i32
    return %c0_i32, %c0_i32_0 : i32, i32
  }
  func.func @transform_7(%arg0: i32) -> (i32, i32, i32) {
    %c0_i32 = arith.constant 0 : i32
    %c0_i32_0 = arith.constant 0 : i32
    %c0_i32_1 = arith.constant 0 : i32
    return %arg0, %c0_i32, %c0_i32_0 : i32, i32, i32
  }
}

</mosaic_0001>

<bundles_post_ra>
// kernel: tpu_custom_call.1
= control target key start
LH: loop header
LB: loop body
LE: loop exit
PB: predicated region body
PF: predicated region fallthrough
CT: control target
= control target key end

     0   :  { %12 = vsyncpa [#allocation4], 0  ;;  %s3624_s0 = inlined_call_operand.vmem [shape: bf16[2,64,128], index: 0, kind: input, shape index: {}]   ;;  %s3625_s1 = inlined_call_operand.vmem [shape: bf16[128,32], index: 1, kind: input, shape index: {}]   ;;  %s3626_s2 = inlined_call_operand.vmem [shape: f32[1,32], index: 2, kind: input, shape index: {}]   ;;  %s3627_s3 = inlined_call_operand.hbm [shape: bf16[32,288], index: 3, kind: input, shape index: {}]   ;;  %s3628_s4 = inlined_call_operand.vmem [shape: f32[1,32], index: 4, kind: input, shape index: {}]   ;;  %s3629_s5 = inlined_call_operand.vmem [shape: bf16[32,128], index: 5, kind: input, shape index: {}]   ;;  %s3630_s6 = inlined_call_operand.vmem [shape: f32[1,128], index: 6, kind: input, shape index: {}]   ;;  %s3631_s7 = inlined_call_operand.hbm [shape: f32[2,64,128], index: 7, kind: output, shape index: {}]  }
   0x1   :  { %13 = vsyncpa [#allocation5], 0  ;;  %s2488_s24 = smov [#allocation3]   ;;  %s2440_s28 = scalar_lea.hbm %s3627_s3, 768 }
   0x2   :  { %s25_s25 = sshll.u32 %s2488_s24, 4  ;;  %p2441_p0 = scmp.ne.s32.totalorder %s3627_s3, %s2440_s28  ;;  %s26_s25 = int_to_ptr.vmem [resolvable:$true] %s25_s25 }
   0x3   :  { %p2444_p1 = scmp.lt.u32.totalorder %s2440_s28, %s3627_s3 }
   0x5   :  { %p2446_p2 = pnand %p2444_p1, %p2441_p0 }
   0x7   :  { %2449 = shalt.err (!%p2446_p2)
}
   0x8   :  { %s2450_s10 = scalar_lea.vmem %s26_s25, 768  ;;  %p2455_p4 = scmp.lt.s32.totalorder %s26_s25, %s26_s25 }
   0x9   :  { %p2451_p3 = scmp.ne.s32.totalorder %s26_s25, %s2450_s10  ;;  %p2456_p5 = scmp.lt.s32.totalorder %s2450_s10, %s2450_s10 }
   0xb   :  { %p2457_p6 = por %p2456_p5, %p2455_p4 }
   0xd   :  { %p2458_p7 = pnand %p2457_p6, %p2451_p3 }
   0xf   :  { %2461 = shalt.err (!%p2458_p7)
}
  0x10   :  { %s2489_s11 = smov 192   ;;  %s2490_s12 = smov 12  }
  0x11   :  { %31 = dma.hbm_to_vmem [thread:$0]  %s3627_s3, 768, %s26_s25, [#allocation4], %s2489_s11, %s2489_s11, %s2490_s12  }
  0x12   :  { %2484 = dma.done.wait [#allocation4], 768  }
  0x13   :  { %2485 = vsyncadd [#allocation4], 4294966528  ;;  %v2554_v0 = vld [vmem:[%s3625_s1] sm:$0xff]   ;;  %v2559_v1 = vld [vmem:[%s3625_s1 + $0x8] sm:$0xff]   ;;  %v3632_v16 = vmov 0   ;;  %vm421_vm0 = vcmask 261120   ;;  %v73_v52 = vlaneseq }
  0x14   :  { %2287 = vmatprep.subr.bf16.mxu0 %v2554_v0  ;;  %v2567_v2 = vld [vmem:[%s3625_s1 + $0x10] sm:$0xff]   ;;  %v2574_v3 = vld [vmem:[%s3625_s1 + $0x18] sm:$0xff]   ;;  %v226_v4 = vld [vmem:[%s3624_s0] sm:$0xff]   ;;  %466 = vmatprep.mubr.bf16.mxu1 %v3632_v16  ;;  %v2492_v61 = vmov 0.0   ;;  %vm707_vm7 = vcmask 1040384   ;;  %vm600_vm9 = vcmask 1046528  }
  0x15   :  { %2288 = vmatpush3.bf16.msra.mxu0 %v2554_v0  ;;  %v2582_v5 = vld [vmem:[%s3625_s1 + $0x20] sm:$0xff]   ;;  %2303 = vmatprep.mubr.bf16.mxu0 %v226_v4  ;;  %v2591_v6 = vld [vmem:[%s3625_s1 + $0x28] sm:$0xff]   ;;  %v2598_v7 = vld [vmem:[%s3625_s1 + $0x30] sm:$0xff]   ;;  %v2681_v53 = vshrl.u32 %v73_v52, 7  ;;  %s2493_s24 = smov 96   ;;  %s2494_s25 = smov 64  }
  0x16   :  { %2289 = vmatprep.subr.bf16.mxu0 %v2559_v1  ;;  %v2605_v8 = vld [vmem:[%s3625_s1 + $0x38] sm:$0xff]   ;;  %v228_v9 = vld [vmem:[%s3624_s0 + $0x8] sm:$0xff]   ;;  %v230_v10 = vld [vmem:[%s3624_s0 + $0x10] sm:$0xff]   ;;  %s2495_s26 = smov 32  }
  0x17   :  { %v232_v11 = vld [vmem:[%s3624_s0 + $0x18] sm:$0xff]   ;;  %v2619_v12 = vld [vmem:[#allocation3 + $0x4] ss:$12 sps:$4 sm:$0xff]   ;;  %v2408_v13 = vld [vmem:[#allocation3] ss:$12 sps:$4 sm:$0xff]   ;;  %v75_v54 = vadd.s32 8, %v2681_v53 }
  0x18   :  { %434 = vmatprep.subr.bf16.mxu1 %v2619_v12  ;;  %v2409_v14 = vld [vmem:[#allocation3 + $0x1c] ss:$12 sps:$4 sm:$0xff]   ;;  %v2411_v15 = vld [vmem:[#allocation3 + $0x18] ss:$12 sps:$4 sm:$0xff]   ;;  %v2629_v18 = vld [vmem:[%s3626_s2] ss:$0 sm:$0xff] }
  0x19   :  { %2290 = vmatpush3.bf16.msra.mxu0 %v2559_v1  ;;  %435 = vmatpush1.bf16.msra.mxu1 %v2408_v13  ;;  %v2623_v17 = vld [vmem:[#allocation3 + $0x8] ss:$12 sps:$4 sm:$0xff]   ;;  %v2413_v34 = vld [vmem:[#allocation3 + $0x20] ss:$12 sps:$4 sm:$0xff]   ;;  %v2221_v51 = vld [vmem:[%s3624_s0 + $0x38] sm:$0xff]   ;;  %v76_v55 = vadd.s32 16, %v2681_v53 }
  0x1a   :  { %2291 = vmatprep.subr.bf16.mxu0 %v2567_v2  ;;  %436 = vmatprep.subr.bf16.mxu1 %v2409_v14  ;;  %v2215_v48 = vld [vmem:[%s3624_s0 + $0x20] sm:$0xff]   ;;  %v2217_v49 = vld [vmem:[%s3624_s0 + $0x28] sm:$0xff]   ;;  %v2219_v50 = vld [vmem:[%s3624_s0 + $0x30] sm:$0xff]   ;;  %v93_v56 = vand.u32 7, %v75_v54  ;;  %v86_v57 = vand.u32 7, %v2681_v53  ;;  %v77_v58 = vadd.s32 24, %v2681_v53 }
  0x1b   :  { %v100_v59 = vand.u32 7, %v76_v55  ;;  %v2712_v14 = vld [vmem:[%s3628_s4] ss:$0 sm:$0xff] }
  0x1c   :  { %vm202_vm1 = vcmp.ne.s32.totalorder %v86_v57, 7  ;;  %v107_v60 = vand.u32 7, %v77_v58  ;;  %vm203_vm2 = vcmp.ne.s32.totalorder %v93_v56, 7  ;;  %vm179_vm3 = vcmp.ne.s32.totalorder %v93_v56, 0 }
  0x1d   :  { %2292 = vmatpush3.bf16.msra.mxu0 %v2567_v2  ;;  %437 = vmatpush1.bf16.msra.mxu1 %v2411_v15  ;;  %vm180_vm4 = vcmp.ne.s32.totalorder %v100_v59, 0  ;;  %v2172_v62 = vsel %vm202_vm1, 1.0, %v2492_v61  ;;  %v2689_v63 = vsel %vm203_vm2, 1.0, %v2492_v61  ;;  %vm178_vm5 = vcmp.ne.s32.totalorder %v86_v57, 0 }
  0x1e   :  { %2293 = vmatprep.subr.bf16.mxu0 %v2574_v3  ;;  %2311 = vmatprep.subr.bf16.mxu1 %v2623_v17  ;;  %vm181_vm6 = vcmp.ne.s32.totalorder %v107_v60, 0  ;;  %v2164_v4 = vsel %vm178_vm5, 1.0, %v2492_v61  ;;  %vm204_vm8 = vcmp.ne.s32.totalorder %v100_v59, 7  ;;  %vm2717_vm10 = vcmp.ne.s32.totalorder %v107_v60, 7 }
  0x1f   :  { %vm794_vm5 = vcmask 253952  }
  0x21   :  { %2294 = vmatpush3.bf16.msra.mxu0 %v2574_v3 }
  0x22   :  { %2295 = vmatprep.subr.bf16.mxu0 %v2582_v5 }
  0x25   :  { %2296 = vmatpush3.bf16.msra.mxu0 %v2582_v5 }
  0x26   :  { %2297 = vmatprep.subr.bf16.mxu0 %v2591_v6 }
  0x29   :  { %2298 = vmatpush3.bf16.msra.mxu0 %v2591_v6 }
  0x2a   :  { %2299 = vmatprep.subr.bf16.mxu0 %v2598_v7 }
  0x2d   :  { %2300 = vmatpush3.bf16.msra.mxu0 %v2598_v7 }
  0x2e   :  { %2301 = vmatprep.subr.bf16.mxu0 %v2605_v8 }
  0x31   :  { %2302 = vmatpush3.bf16.msra.mxu0 %v2605_v8 }
  0x34   :  { %2304 = vmatmul.mubr.bf16.vlgmr.msra.gmra.mrb[0].mxu0 %v228_v9 }
  0x35   :  { %2307 = vmatprep.mubr.bf16.mxu0 %v230_v10  ;;  %v2702_v10 = vrot.slane %v2164_v4, 1 }
  0x3c   :  { %2308 = vmatmul.mubr.bf16.gmra.mrb[4].mxu0 %v232_v11 }
 0x107   :  { %v2305_v19 = vpop.f32.mrb[0].mxu0 }
 0x108   :  { %v355_v20 = vadd.f32 %v2305_v19, %v2629_v18  ;;  %v346_v21 = vpop.f32.mrb[1].mxu0  ;;  %v2174_v19 = vsel %vm204_vm8, 1.0, %v2492_v61 }
 0x109   :  { %v347_v22 = vadd.f32 %v2629_v18, %v346_v21  ;;  %v2306_v23 = vpop.f32.mrb[2].mxu0 }
 0x10a   :  { %v358_v24 = vadd.f32 %v2306_v23, %v2629_v18  ;;  %v349_v25 = vpop.f32.mrb[3].mxu0  ;;  %v379_v27 = vmax.f32 %v355_v20, 0.0 }
 0x10b   :  { %v350_v26 = vadd.f32 %v2629_v18, %v349_v25  ;;  %v377_v29 = vmax.f32 %v347_v22, 0.0 }
 0x10c   :  { %v380_v28 = vmax.f32 %v358_v24, 0.0 }
 0x10d   :  { %v378_v30 = vmax.f32 %v350_v26, 0.0 }
 0x10e   :  { %v386_v31 = vpack.c.bf16 %v380_v28, %v379_v27 }
 0x10f   :  { %v385_v32 = vpack.c.bf16 %v378_v30, %v377_v29  ;;  %v2309_v33 = vpop.f32.mrb[4].mxu0 }
 0x110   :  { %v371_v35 = vadd.f32 %v2309_v33, %v2629_v18  ;;  %v362_v36 = vpop.f32.mrb[5].mxu0  ;;  %v2748_v33 = vsel %vm2717_vm10, 1.0, %v2492_v61 }
 0x111   :  { %2199 = vmatmul.mubr.msk.bf16.vlgmr.msra.gmra.mrb[0].mxu1 %vm421_vm0, %v385_v32  ;;  %v363_v37 = vadd.f32 %v2629_v18, %v362_v36  ;;  %v2310_v38 = vpop.f32.mrb[6].mxu0 }
 0x112   :  { %v383_v39 = vmax.f32 %v371_v35, 0.0  ;;  %476 = vmatprep.mubr.bf16.mxu1 %v3632_v16  ;;  %v374_v40 = vadd.f32 %v2310_v38, %v2629_v18  ;;  %v365_v41 = vpop.f32.mrb[7].mxu0  ;;  %2312 = vmatpush3.bf16.msra.mxu1 %v2623_v17 }
 0x113   :  { %v381_v42 = vmax.f32 %v363_v37, 0.0  ;;  %v366_v43 = vadd.f32 %v2629_v18, %v365_v41  ;;  %2313 = vmatprep.subr.bf16.mxu1 %v2413_v34  ;;  %v81_v41 = vadd.s32 56, %v2681_v53 }
 0x114   :  { %v384_v44 = vmax.f32 %v374_v40, 0.0  ;;  %v80_v40 = vadd.s32 48, %v2681_v53 }
 0x115   :  { %v382_v45 = vmax.f32 %v366_v43, 0.0  ;;  %v135_v58 = vand.u32 7, %v81_v41 }
 0x116   :  { %v388_v46 = vpack.c.bf16 %v384_v44, %v383_v39  ;;  %2314 = vmatpush3.bf16.msra.mxu1 %v2413_v34  ;;  %v713_v44 = vrot.slane %v2748_v33, 7  ;;  %v128_v57 = vand.u32 7, %v80_v40 }
 0x117   :  { %v387_v47 = vpack.c.bf16 %v382_v45, %v381_v42  ;;  %2335 = vmatprep.subr.bf16.mxu1 %v2554_v0  ;;  %vm2832_vm1 = vcmp.ne.s32.totalorder %v135_v58, 0 }
 0x118   :  { %vm184_vm15 = vcmp.ne.s32.totalorder %v128_v57, 0  ;;  %vm2838_vm2 = vcmp.ne.s32.totalorder %v128_v57, 7 }
 0x119   :  { %2200 = vmatmul.mubr.msk.bf16.gmra.mrb[4].mxu1 %vm421_vm0, %v386_v31  ;;  %v2170_v37 = vsel %vm184_vm15, 1.0, %v2492_v61 }
 0x11a   :  { %486 = vmatprep.mubr.bf16.mxu1 %v3632_v16 }
 0x121   :  { %2201 = vmatmul.mubr.msk.bf16.gmra.mrb[8].mxu1 %vm421_vm0, %v387_v47 }
 0x122   :  { %496 = vmatprep.mubr.bf16.mxu1 %v3632_v16 }
 0x129   :  { %2202 = vmatmul.mubr.msk.bf16.gmra.mrb[12].mxu1 %vm421_vm0, %v388_v46 }
 0x12a   :  { %2315 = vmatprep.mubr.msk.bf16.mxu1 %vm421_vm0, %v385_v32  ;;  %v711_v32 = vrot.slane %v2174_v19, 7 }
 0x131   :  { %2316 = vmatmul.mubr.msk.bf16.vlgmr.msra.gmra.mrb[16].mxu1 %vm421_vm0, %v386_v31 }
 0x132   :  { %2319 = vmatprep.mubr.msk.bf16.mxu1 %vm421_vm0, %v387_v47  ;;  %2336 = vmatpush3.bf16.msra.mxu1 %v2554_v0  ;;  %v2165_v0 = vsel %vm179_vm3, 1.0, %v2492_v61  ;;  %vm2862_vm3 = vcmp.ne.s32.totalorder %v135_v58, 7 }
 0x133   :  { %2337 = vmatprep.subr.bf16.mxu1 %v2559_v1  ;;  %v2179_v58 = vsel %vm2862_vm3, 1.0, %v2492_v61 }
 0x136   :  { %2338 = vmatpush3.bf16.msra.mxu1 %v2559_v1  ;;  %v2166_v1 = vsel %vm180_vm4, 1.0, %v2492_v61  ;;  %vm648_vm4 = vcmask 260096  }
 0x137   :  { %2339 = vmatprep.subr.bf16.mxu1 %v2567_v2  ;;  %v602_v9 = vrot.slane %v2166_v1, 1 }
 0x139   :  { %2320 = vmatmul.mubr.msk.bf16.gmra.mrb[20].mxu1 %vm421_vm0, %v388_v46 }
 0x13a   :  { %2340 = vmatpush3.bf16.msra.mxu1 %v2567_v2  ;;  %2351 = vmatprep.mubr.bf16.mxu1 %v2215_v48  ;;  %v2693_v2 = vrot.slane %v2172_v62, 7 }
 0x13b   :  { %2341 = vmatprep.subr.bf16.mxu1 %v2574_v3 }
 0x13e   :  { %2342 = vmatpush3.bf16.msra.mxu1 %v2574_v3  ;;  %v709_v3 = vrot.slane %v2689_v63, 7 }
 0x13f   :  { %2343 = vmatprep.subr.bf16.mxu1 %v2582_v5 }
 0x140   :  { %v2707_v13 = vsel %vm707_vm7, %v2693_v2, %v709_v3 }
 0x142   :  { %2344 = vmatpush3.bf16.msra.mxu1 %v2582_v5  ;;  %v2698_v5 = vsel %vm181_vm6, 1.0, %v2492_v61 }
 0x143   :  { %2345 = vmatprep.subr.bf16.mxu1 %v2591_v6  ;;  %v604_v11 = vrot.slane %v2698_v5, 1 }
 0x145   :  { %v2735_v28 = vsel %vm600_vm9, %v602_v9, %v604_v11 }
 0x146   :  { %2346 = vmatpush3.bf16.msra.mxu1 %v2591_v6  ;;  %v78_v6 = vadd.s32 32, %v2681_v53 }
 0x147   :  { %2347 = vmatprep.subr.bf16.mxu1 %v2598_v7 }
 0x148   :  { %v114_v15 = vand.u32 7, %v78_v6  ;;  %v2820_v6 = vsel %vm707_vm7, %v711_v32, %v713_v44 }
 0x14a   :  { %2348 = vmatpush3.bf16.msra.mxu1 %v2598_v7  ;;  %v79_v7 = vadd.s32 40, %v2681_v53  ;;  %vm182_vm11 = vcmp.ne.s32.totalorder %v114_v15, 0  ;;  %vm2759_vm13 = vcmp.ne.s32.totalorder %v114_v15, 7 }
 0x14b   :  { %2349 = vmatprep.subr.bf16.mxu1 %v2605_v8  ;;  %v2168_v43 = vsel %vm182_vm11, 1.0, %v2492_v61  ;;  %v2176_v54 = vsel %vm2759_vm13, 1.0, %v2492_v61 }
 0x14c   :  { %v121_v20 = vand.u32 7, %v79_v7  ;;  %v606_v55 = vrot.slane %v2168_v43, 1 }
 0x14e   :  { %2350 = vmatpush3.bf16.msra.mxu1 %v2605_v8  ;;  %v601_v8 = vrot.slane %v2165_v0, 1  ;;  %vm2755_vm12 = vcmp.ne.s32.totalorder %v121_v20, 0  ;;  %vm2777_vm14 = vcmp.ne.s32.totalorder %v121_v20, 7  ;;  %v2848_v33 = vsel %vm600_vm9, %v604_v11, %v606_v55 }
 0x14f   :  { %2359 = vmatprep.subr.bf16.mxu1 %v2623_v17  ;;  %v2789_v52 = vsel %vm2755_vm12, 1.0, %v2492_v61  ;;  %v2812_v1 = vsel %vm2777_vm14, 1.0, %v2492_v61 }
 0x150   :  { %v2722_v22 = vsel %vm600_vm9, %v601_v8, %v602_v9  ;;  %v2739_v29 = vsel %vm600_vm9, %v2702_v10, %v601_v8  ;;  %v715_v8 = vrot.slane %v2176_v54, 7 }
 0x151   :  { %2352 = vmatmul.mubr.bf16.vlgmr.msra.gmra.mrb[24].mxu1 %v2217_v49 }
 0x152   :  { %2360 = vmatpush3.bf16.msra.mxu1 %v2623_v17  ;;  %2355 = vmatprep.mubr.bf16.mxu1 %v2219_v50 }
 0x153   :  { %2361 = vmatprep.subr.bf16.mxu1 %v2413_v34 }
 0x156   :  { %2362 = vmatpush3.bf16.msra.mxu1 %v2413_v34 }
 0x159   :  { %2356 = vmatmul.mubr.bf16.gmra.mrb[28].mxu1 %v2221_v51  ;;  %v2784_v51 = vsel %vm707_vm7, %v709_v3, %v711_v32  ;;  %v608_v3 = vrot.slane %v2789_v52, 1 }
 0x15b   :  { %v2875_v40 = vsel %vm600_vm9, %v606_v55, %v608_v3  ;;  %v610_v55 = vrot.slane %v2170_v37, 1 }
 0x1e4   :  { %v2714_v17 = vpop.f32.mrb[0].mxu1 }
 0x1e5   :  { %664 = vrot.lane.b32.xlu0 %v2714_v17, %s2493_s24  ;;  %v470_v23 = vpop.f32.mrb[1].mxu1  ;;  %v731_v24 = vmul.f32 %v2707_v13, %v2714_v17  ;;  %v800_v47 = vmul.f32 %v2739_v29, %v2714_v17 }
 0x1e6   :  { %v577_v25 = vadd.f32 %v2712_v14, %v470_v23  ;;  %v865_v26 = vmul.f32 %v2693_v2, %v470_v23  ;;  %v2730_v27 = vpop.f32.mrb[2].mxu1  ;;  %v945_v30 = vmul.f32 %v2702_v10, %v470_v23  ;;  %v717_v23 = vrot.slane %v2812_v1, 7 }
 0x1e7   :  { %755 = vrot.lane.b32.xlu1 %v731_v24, %s2494_s25  ;;  %v2743_v31 = vpop.f32.mrb[3].mxu1  ;;  %v801_v39 = vmul.f32 %v2722_v22, %v2730_v27  ;;  %v732_v7 = vmul.f32 %v2784_v51, %v2730_v27 }
 0x1e8   :  { %585 = vst.msk [vmem:[#allocation2] sm:$0xff] %vm421_vm0, %v577_v25  ;;  %v578_v34 = vadd.f32 %v2712_v14, %v2743_v31  ;;  %v866_v35 = vmul.f32 %v2707_v13, %v2743_v31  ;;  %v946_v38 = vmul.f32 %v2739_v29, %v2743_v31  ;;  %v889_v42 = vrot.slane %v865_v26, 1 }
 0x1e9   :  { %666 = vrot.lane.b32.xlu0 %v2730_v27, %s2493_s24  ;;  %v969_v46 = vrot.slane %v945_v30, 7  ;;  %v2886_v43 = vsel %vm707_vm7, %v715_v8, %v717_v23  ;;  %v2927_v25 = vrot.slane %v2179_v58, 7 }
 0x1ea   :  { %586 = vst.msk [vmem:[#allocation2 + $0x8] sm:$0xff] %vm421_vm0, %v578_v34  ;;  %v890_v45 = vrot.slane %v866_v35, 1  ;;  %v970_v49 = vrot.slane %v946_v38, 7  ;;  %v2854_v35 = vsel %vm707_vm7, %v713_v44, %v715_v8  ;;  %v2178_v44 = vsel %vm2838_vm2, 1.0, %v2492_v61 }
 0x1eb   :  { %826 = vrot.lane.b32.xlu1 %v801_v39, %s2495_s26 }
 0x1ec   :  { %v2781_v50 = vpop.f32.mrb[4].mxu1  ;;  %v891_v53 = vsel %vm600_vm9, %v889_v42, %v890_v45  ;;  %v2799_v59 = vsel %vm707_vm7, %v969_v46, %v970_v49  ;;  %v2171_v42 = vsel %vm2832_vm1, 1.0, %v2492_v61 }
 0x1ed   :  { %824 = vrot.lane.b32.xlu0 %v800_v47, %s2495_s26  ;;  %v2796_v56 = vpop.f32.mrb[5].mxu1  ;;  %v802_v34 = vmul.f32 %v2735_v28, %v2781_v50  ;;  %v733_v8 = vmul.f32 %v2820_v6, %v2781_v50 }
 0x1ee   :  { %v579_v60 = vadd.f32 %v2712_v14, %v2796_v56  ;;  %v867_v62 = vmul.f32 %v2784_v51, %v2796_v56  ;;  %v947_v63 = vmul.f32 %v2722_v22, %v2796_v56  ;;  %v2807_v0 = vpop.f32.mrb[6].mxu1 }
 0x1ef   :  { %668 = vrot.lane.b32.xlu1 %v2781_v50, %s2493_s24  ;;  %v2817_v4 = vpop.f32.mrb[7].mxu1  ;;  %v734_v57 = vmul.f32 %v2854_v35, %v2807_v0  ;;  %v624_v1 = vmul.f32 %v2875_v40, %v2807_v0 }
 0x1f0   :  { %587 = vst.msk [vmem:[#allocation2 + $0x10] sm:$0xff] %vm421_vm0, %v579_v60  ;;  %v580_v9 = vadd.f32 %v2712_v14, %v2817_v4  ;;  %v868_v15 = vmul.f32 %v2820_v6, %v2817_v4  ;;  %v948_v19 = vmul.f32 %v2735_v28, %v2817_v4  ;;  %v892_v20 = vrot.slane %v867_v62, 1 }
 0x1f1   :  { %757 = vrot.lane.b32.xlu0 %v732_v7, %s2494_s25  ;;  %v972_v24 = vrot.slane %v947_v63, 7 }
 0x1f2   :  { %588 = vst.msk [vmem:[#allocation2 + $0x18] sm:$0xff] %vm421_vm0, %v580_v9  ;;  %v2843_v26 = vsel %vm600_vm9, %v890_v45, %v892_v20  ;;  %v894_v30 = vrot.slane %v868_v15, 1  ;;  %v974_v32 = vrot.slane %v948_v19, 7  ;;  %v621_v45 = vmul.f32 %v2722_v22, %v2714_v17 }
 0x1f3   :  { %904 = vrot.lane.b32.xlu1 %v891_v53, %s2493_s24  ;;  %v2857_v36 = vsel %vm707_vm7, %v970_v49, %v972_v24  ;;  %v622_v53 = vmul.f32 %v2735_v28, %v2730_v27  ;;  %v719_v9 = vrot.slane %v2178_v44, 7 }
 0x1f4   :  { %v2860_v38 = vpop.f32.mrb[8].mxu1  ;;  %v2867_v11 = vsel %vm600_vm9, %v892_v20, %v894_v30  ;;  %v2870_v39 = vsel %vm707_vm7, %v972_v24, %v974_v32  ;;  %v2924_v24 = vrot.slane %v2171_v42, 1 }
 0x1f5   :  { %828 = vrot.lane.b32.xlu0 %v802_v34, %s2495_s26  ;;  %v2878_v41 = vpop.f32.mrb[9].mxu1  ;;  %v804_v58 = vmul.f32 %v2875_v40, %v2860_v38 }
 0x1f6   :  { %v581_v46 = vadd.f32 %v2712_v14, %v2878_v41  ;;  %v869_v47 = vmul.f32 %v2854_v35, %v2878_v41  ;;  %v949_v48 = vmul.f32 %v2848_v33, %v2878_v41  ;;  %v2899_v49 = vpop.f32.mrb[10].mxu1 }
 0x1f7   :  { %v628_v54 = vld [vmem:[#allocation2 + $0x9] sm:$0xff]  ;;  %670 = vrot.lane.b32.xlu1 %v2807_v0, %s2493_s24  ;;  %v2905_v17 = vpop.f32.mrb[11].mxu1 }
 0x1f8   :  { %v635_v60 = vadd.f32 %v628_v54, %v621_v45  ;;  %589 = vst.msk [vmem:[#allocation2 + $0x20] sm:$0xff] %vm421_vm0, %v581_v46  ;;  %v582_v27 = vadd.f32 %v2712_v14, %v2905_v17  ;;  %v870_v62 = vmul.f32 %v2886_v43, %v2905_v17  ;;  %v950_v63 = vmul.f32 %v2875_v40, %v2905_v17 }
 0x1f9   :  { %v629_v7 = vld [vmem:[#allocation2 + $0x11] sm:$0xff]  ;;  %761 = vrot.lane.b32.xlu0 %v734_v57, %s2494_s25  ;;  %v896_v61 = vrot.slane %v869_v47, 1  ;;  %v976_v15 = vrot.slane %v949_v48, 7  ;;  %v2947_v45 = vsel %vm600_vm9, %v608_v3, %v610_v55  ;;  %v803_v46 = vmul.f32 %v2848_v33, %v2807_v0 }
 0x1fa   :  { %642 = vst.msk [vmem:[#allocation2 + $0x9] sm:$0xff] %vm421_vm0, %v635_v60  ;;  %v636_v19 = vadd.f32 %v629_v7, %v622_v53  ;;  %590 = vst.msk [vmem:[#allocation2 + $0x28] sm:$0xff] %vm421_vm0, %v582_v27  ;;  %v898_v20 = vrot.slane %v870_v62, 1  ;;  %v978_v21 = vrot.slane %v950_v63, 7  ;;  %v623_v47 = vmul.f32 %v2848_v33, %v2781_v50 }
 0x1fb   :  { %759 = vrot.lane.b32.xlu1 %v733_v8, %s2494_s25  ;;  %v2930_v34 = vsel %vm600_vm9, %v894_v30, %v896_v61  ;;  %v2933_v37 = vsel %vm707_vm7, %v974_v32, %v976_v15  ;;  %v2956_v32 = vsel %vm707_vm7, %v717_v23, %v719_v9  ;;  %v2974_v54 = vsel %vm600_vm9, %v610_v55, %v2924_v24 }
 0x1fc   :  { %643 = vst.msk [vmem:[#allocation2 + $0x11] sm:$0xff] %vm421_vm0, %v636_v19  ;;  %v2936_v5 = vpop.f32.mrb[12].mxu1  ;;  %v2939_v44 = vsel %vm600_vm9, %v896_v61, %v898_v20  ;;  %v2942_v42 = vsel %vm707_vm7, %v976_v15, %v978_v21  ;;  %v2981_v57 = vsel %vm707_vm7, %v719_v9, %v2927_v25  ;;  %v736_v61 = vmul.f32 %v2956_v32, %v2899_v49 }
 0x1fd   :  { %672 = vrot.lane.b32.xlu0 %v2860_v38, %s2493_s24  ;;  %v2951_v30 = vpop.f32.mrb[13].mxu1 }
 0x1fe   :  { %v583_v52 = vadd.f32 %v2712_v14, %v2951_v30  ;;  %v871_v3 = vmul.f32 %v2956_v32, %v2951_v30  ;;  %v951_v48 = vmul.f32 %v2947_v45, %v2951_v30  ;;  %v2968_v53 = vpop.f32.mrb[14].mxu1 }
 0x1ff   :  { %v630_v23 = vld [vmem:[#allocation2 + $0x19] sm:$0xff]  ;;  %830 = vrot.lane.b32.xlu1 %v803_v46, %s2495_s26  ;;  %v2977_v50 = vpop.f32.mrb[15].mxu1 }
 0x200   :  { %v637_v60 = vadd.f32 %v630_v23, %v623_v47  ;;  %591 = vst.msk [vmem:[#allocation2 + $0x30] sm:$0xff] %vm421_vm0, %v583_v52  ;;  %v584_v0 = vadd.f32 %v2712_v14, %v2977_v50  ;;  %v2990_v55 = vmul.f32 %v2981_v57, %v2977_v50  ;;  %v2994_v27 = vmul.f32 %v2974_v54, %v2977_v50 }
 0x201   :  { %v631_v62 = vld [vmem:[#allocation2 + $0x21] sm:$0xff]  ;;  %832 = vrot.lane.b32.xlu0 %v804_v58, %s2495_s26  ;;  %v900_v63 = vrot.slane %v871_v3, 1  ;;  %v980_v7 = vrot.slane %v951_v48, 7  ;;  %v625_v48 = vmul.f32 %v2947_v45, %v2860_v38 }
 0x202   :  { %644 = vst.msk [vmem:[#allocation2 + $0x19] sm:$0xff] %vm421_vm0, %v637_v60  ;;  %v638_v8 = vadd.f32 %v631_v62, %v624_v1  ;;  %592 = vst.msk [vmem:[#allocation2 + $0x38] sm:$0xff] %vm421_vm0, %v584_v0  ;;  %v902_v14 = vrot.slane %v2990_v55, 1  ;;  %v982_v9 = vrot.slane %v2994_v27, 7  ;;  %v626_v0 = vmul.f32 %v2974_v54, %v2899_v49 }
 0x203   :  { %674 = vrot.lane.b32.xlu1 %v2899_v49, %s2493_s24  ;;  %v3006_v15 = vsel %vm600_vm9, %v898_v20, %v900_v63  ;;  %v3009_v19 = vsel %vm707_vm7, %v978_v21, %v980_v7  ;;  %v735_v21 = vmul.f32 %v2886_v43, %v2860_v38  ;;  %v627_v62 = vmul.f32 %v2924_v24, %v2936_v5 }
 0x204   :  { %645 = vst.msk [vmem:[#allocation2 + $0x21] sm:$0xff] %vm421_vm0, %v638_v8  ;;  %v2317_v46 = vpop.f32.mrb[16].mxu1  ;;  %v3015_v47 = vsel %vm600_vm9, %v900_v63, %v902_v14  ;;  %v3020_v52 = vsel %vm707_vm7, %v980_v7, %v982_v9 }
 0x205   :  { %v1074_v3 = vmul.f32 %v2317_v46, %v2707_v13  ;;  %765 = vrot.lane.b32.xlu0 %v736_v61, %s2494_s25  ;;  %v541_v20 = vpop.f32.mrb[17].mxu1 }
 0x206   :  { %v2318_v1 = vpop.f32.mrb[18].mxu1  ;;  %v805_v20 = vmul.f32 %v2947_v45, %v2899_v49 }
 0x207   :  { %v632_v23 = vld [vmem:[#allocation2 + $0x29] sm:$0xff]  ;;  %v1075_v58 = vmul.f32 %v2318_v1, %v2784_v51  ;;  %763 = vrot.lane.b32.xlu1 %v735_v21, %s2494_s25  ;;  %v543_v60 = vpop.f32.mrb[19].mxu1  ;;  %v1095_v38 = vrot.slane %v1074_v3, 1 }
 0x208   :  { %v639_v63 = vadd.f32 %v632_v23, %v625_v48  ;;  %v1073_v7 = vmul.f32 %v2693_v2, %v543_v60 }
 0x209   :  { %v633_v8 = vld [vmem:[#allocation2 + $0x31] sm:$0xff]  ;;  %v634_v61 = vld [vmem:[#allocation2 + $0x39] sm:$0x7f]  ;;  %v1097_v46 = vrot.slane %v1075_v58, 1  ;;  %676 = vrot.lane.b32.xlu0 %v2936_v5, %s2493_s24 }
 0x20a   :  { %646 = vst.msk [vmem:[#allocation2 + $0x29] sm:$0xff] %vm421_vm0, %v639_v63  ;;  %v640_v21 = vadd.f32 %v633_v8, %v626_v0  ;;  %v641_v1 = vadd.f32 %v634_v61, %v627_v62  ;;  %v1094_v16 = vrot.slane %v1073_v7, 1 }
 0x20b   :  { %v3041_v48 = vsel %vm600_vm9, %v1095_v38, %v1097_v46  ;;  %834 = vrot.lane.b32.xlu1 %v805_v20, %s2495_s26 }
 0x20c   :  { %647 = vst.msk [vmem:[#allocation2 + $0x31] sm:$0xff] %vm421_vm0, %v640_v21  ;;  %v3047_v3 = vsel %vm600_vm9, %v1094_v16, %v1095_v38  ;;  %v2321_v23 = vpop.f32.mrb[20].mxu1 }
 0x20d   :  { %649 = vst.msk [vmem:[#allocation2 + $0x39] sm:$0x7f] %vm648_vm4, %v641_v1  ;;  %v1078_v49 = vmul.f32 %v2321_v23, %v2886_v43  ;;  %906 = vrot.lane.b32.xlu0 %v2843_v26, %s2493_s24  ;;  %v556_v58 = vpop.f32.mrb[21].mxu1  ;;  %v737_v26 = vmul.f32 %v2981_v57, %v2936_v5 }
 0x20e   :  { %v1076_v60 = vmul.f32 %v2820_v6, %v556_v58  ;;  %v2322_v0 = vpop.f32.mrb[22].mxu1 }
 0x20f   :  { %v3054_v62 = vmul.f32 %v2322_v0, %v2956_v32  ;;  %908 = vrot.lane.b32.xlu1 %v2867_v11, %s2493_s24  ;;  %v559_v63 = vpop.f32.mrb[23].mxu1  ;;  %v1103_v8 = vrot.slane %v1078_v49, 1 }
 0x210   :  { %v1099_v7 = vrot.slane %v1076_v60, 1  ;;  %v1077_v16 = vmul.f32 %v2854_v35, %v559_v63 }
 0x211   :  { %v1105_v61 = vrot.slane %v3054_v62, 1  ;;  %910 = vrot.lane.b32.xlu0 %v2930_v34, %s2493_s24  ;;  %v806_v34 = vmul.f32 %v2974_v54, %v2936_v5  ;;  %v2429_v62 = vld [vmem:[#allocation3 + $0x1c] ss:$12 sps:$4 sm:$0xff]  }
 0x212   :  { %v3065_v38 = vsel %vm600_vm9, %v1097_v46, %v1099_v7  ;;  %v1101_v20 = vrot.slane %v1077_v16, 1 }
 0x213   :  { %v3070_v11 = vsel %vm600_vm9, %v1103_v8, %v1105_v61  ;;  %767 = vrot.lane.b32.xlu1 %v737_v26, %s2494_s25 }
 0x214   :  { %v3074_v21 = vsel %vm600_vm9, %v1099_v7, %v1101_v20  ;;  %v3077_v1 = vsel %vm600_vm9, %v1101_v20, %v1103_v8  ;;  %v650_v8 = vld [vmem:[#allocation2 + $0x8] sm:$0xff] }
 0x215   :  { %986 = vrot.lane.b32.xlu0 %v2857_v36, %s2494_s25  ;;  %v738_v36 = vmul.f32 %v2927_v25, %v2968_v53 }
 0x217   :  { %912 = vrot.lane.b32.xlu1 %v2939_v44, %s2493_s24 }
 0x219   :  { %990 = vrot.lane.b32.xlu0 %v2933_v37, %s2494_s25 }
 0x21b   :  { %984 = vrot.lane.b32.xlu1 %v2799_v59, %s2494_s25  ;;  %v807_v59 = vmul.f32 %v2924_v24, %v2968_v53 }
 0x21d   :  { %836 = vrot.lane.b32.xlu0 %v806_v34, %s2495_s26 }
 0x21f   :  { %988 = vrot.lane.b32.xlu1 %v2870_v39, %s2494_s25 }
 0x221   :  { %914 = vrot.lane.b32.xlu0 %v3006_v15, %s2493_s24 }
 0x223   :  { %992 = vrot.lane.b32.xlu1 %v2942_v42, %s2494_s25 }
 0x225   :  { %994 = vrot.lane.b32.xlu0 %v3009_v19, %s2494_s25 }
 0x227   :  { %769 = vrot.lane.b32.xlu1 %v738_v36, %s2494_s25 }
 0x229   :  { %916 = vrot.lane.b32.xlu0 %v3015_v47, %s2493_s24 }
 0x22b   :  { %1038 = vrot.lane.b32.xlu1 %v2743_v31, %s2495_s26  ;;  %v3121_v31 = vld [vmem:[%s3629_s5] sm:$0xff]  }
 0x22c   :  { %2323 = vmatprep.subr.bf16.mxu0 %v3121_v31 }
 0x22d   :  { %1040 = vrot.lane.b32.xlu0 %v2796_v56, %s2495_s26  ;;  %2324 = vmatpush3.bf16.msra.mxu0 %v3121_v31  ;;  %v2353_v56 = vpop.f32.mrb[24].mxu1 }
 0x22e   :  { %v1342_v39 = vpop.f32.mrb[25].mxu1 }
 0x22f   :  { %838 = vrot.lane.b32.xlu1 %v807_v59, %s2495_s26  ;;  %v2354_v37 = vpop.f32.mrb[26].mxu1 }
 0x230   :  { %v1354_v5 = vadd.f32 %v2354_v37, %v2629_v18  ;;  %v1345_v44 = vpop.f32.mrb[27].mxu1 }
 0x231   :  { %996 = vrot.lane.b32.xlu0 %v3020_v52, %s2494_s25  ;;  %v1346_v53 = vadd.f32 %v2629_v18, %v1345_v44  ;;  %v2357_v19 = vpop.f32.mrb[28].mxu1 }
 0x232   :  { %v1376_v55 = vmax.f32 %v1354_v5, 0.0  ;;  %v1367_v47 = vadd.f32 %v2357_v19, %v2629_v18  ;;  %v1358_v52 = vpop.f32.mrb[29].mxu1  ;;  %v653_v19 = vld [vmem:[#allocation2 + $0x20] sm:$0xff] }
 0x233   :  { %1042 = vrot.lane.b32.xlu1 %v2817_v4, %s2495_s26  ;;  %v3133_v4 = vld [vmem:[%s3629_s5 + $0x8] sm:$0xff]   ;;  %v1359_v46 = vadd.f32 %v2629_v18, %v1358_v52  ;;  %v2358_v23 = vpop.f32.mrb[30].mxu1 }
 0x234   :  { %2325 = vmatprep.subr.bf16.mxu0 %v3133_v4  ;;  %v1379_v27 = vmax.f32 %v1367_v47, 0.0  ;;  %v1361_v49 = vpop.f32.mrb[31].mxu1 }
 0x235   :  { %1044 = vrot.lane.b32.xlu0 %v2878_v41, %s2495_s26  ;;  %v1351_v41 = vadd.f32 %v2353_v56, %v2629_v18  ;;  %2326 = vmatpush3.bf16.msra.mxu0 %v3133_v4  ;;  %v1362_v58 = vadd.f32 %v2629_v18, %v1361_v49 }
 0x236   :  { %1397 = vmatprep.subr.bf16.mxu0 %v2619_v12  ;;  %v1377_v12 = vmax.f32 %v1359_v46, 0.0 }
 0x237   :  { %1046 = vrot.lane.b32.xlu1 %v2905_v17, %s2495_s26  ;;  %v1343_v17 = vadd.f32 %v2629_v18, %v1342_v39  ;;  %v1375_v42 = vmax.f32 %v1351_v41, 0.0  ;;  %v1378_v0 = vmax.f32 %v1362_v58, 0.0  ;;  %v654_v58 = vld [vmem:[#allocation2 + $0x28] sm:$0xff] }
 0x239   :  { %1048 = vrot.lane.b32.xlu0 %v2951_v30, %s2495_s26  ;;  %v1373_v30 = vmax.f32 %v1343_v17, 0.0  ;;  %v3161_v7 = vpack.c.bf16 %v1378_v0, %v1377_v12  ;;  %v652_v17 = vld [vmem:[#allocation2 + $0x18] sm:$0xff] }
 0x23b   :  { %918 = vrot.lane.b32.xlu1 %v902_v14, %s2493_s24  ;;  %v1374_v14 = vmax.f32 %v1346_v53, 0.0 }
 0x23d   :  { %1050 = vrot.lane.b32.xlu0 %v2977_v50, %s2495_s26  ;;  %v3147_v50 = vpack.c.bf16 %v1376_v55, %v1375_v42  ;;  %v3149_v15 = vpack.c.bf16 %v1374_v14, %v1373_v30 }
 0x23f   :  { %998 = vrot.lane.b32.xlu1 %v982_v9, %s2494_s25  ;;  %2363 = vmatprep.mubr.msk.bf16.mxu1 %vm421_vm0, %v3149_v15  ;;  %v1370_v9 = vadd.f32 %v2358_v23, %v2629_v18  ;;  %v651_v18 = vld [vmem:[#allocation2 + $0x10] sm:$0xff] }
 0x240   :  { %2364 = vmatmul.mubr.msk.bf16.vlgmr.msra.gmra.mrb[32].mxu1 %vm421_vm0, %v3147_v50 }
 0x241   :  { %v1380_v60 = vmax.f32 %v1370_v9, 0.0  ;;  %2367 = vmatprep.mubr.msk.bf16.mxu1 %vm421_vm0, %v3161_v7 }
 0x243   :  { %v3159_v63 = vpack.c.bf16 %v1380_v60, %v1379_v27 }
 0x248   :  { %2368 = vmatmul.mubr.msk.bf16.gmra.mrb[36].mxu1 %vm421_vm0, %v3159_v63 }
 0x257   :  { %v665_v16 = vpop.permute.xlu0 %664 }
 0x258   :  { %v685_v26 = vadd.f32 %v665_v16, %v650_v8 }
 0x259   :  { %v756_v20 = vpop.permute.xlu1 %755 }
 0x25a   :  { %692 = vst.msk [vmem:[#allocation2 + $0x8] sm:$0xff] %vm421_vm0, %v685_v26 }
 0x25b   :  { %v667_v34 = vpop.permute.xlu0 %666 }
 0x25c   :  { %v686_v36 = vadd.f32 %v667_v34, %v651_v18 }
 0x25d   :  { %v827_v59 = vpop.permute.xlu1 %826 }
 0x25e   :  { %693 = vst.msk [vmem:[#allocation2 + $0x10] sm:$0xff] %vm421_vm0, %v686_v36 }
 0x25f   :  { %v825_v56 = vpop.permute.xlu0 %824 }
 0x261   :  { %v739_v39 = vld [vmem:[#allocation2 + $0x7] sm:$0xff]  ;;  %v669_v41 = vpop.permute.xlu1 %668 }
 0x262   :  { %v779_v37 = vadd.f32 %v756_v20, %v739_v39  ;;  %v687_v5 = vadd.f32 %v669_v41, %v652_v17 }
 0x263   :  { %v758_v44 = vpop.permute.xlu0 %757 }
 0x264   :  { %787 = vst.msk [vmem:[#allocation2 + $0x7] sm:$0xff] %vm421_vm0, %v779_v37  ;;  %694 = vst.msk [vmem:[#allocation2 + $0x18] sm:$0xff] %vm421_vm0, %v687_v5 }
 0x265   :  { %v740_v42 = vld [vmem:[#allocation2 + $0xf] sm:$0xff]  ;;  %v905_v30 = vpop.permute.xlu1 %904 }
 0x266   :  { %v780_v53 = vadd.f32 %v758_v44, %v740_v42 }
 0x267   :  { %v829_v55 = vpop.permute.xlu0 %828 }
 0x268   :  { %788 = vst.msk [vmem:[#allocation2 + $0xf] sm:$0xff] %vm421_vm0, %v780_v53 }
 0x269   :  { %v671_v14 = vpop.permute.xlu1 %670 }
 0x26a   :  { %v688_v47 = vadd.f32 %v671_v14, %v653_v19  ;;  %v656_v14 = vld [vmem:[#allocation2 + $0x38] sm:$0xff] }
 0x26b   :  { %v808_v52 = vld [vmem:[#allocation2 + $0x1] sm:$0xff]  ;;  %v762_v46 = vpop.permute.xlu0 %761  ;;  %v741_v9 = vld [vmem:[#allocation2 + $0x17] sm:$0xff] }
 0x26c   :  { %v848_v23 = vadd.f32 %v825_v56, %v808_v52  ;;  %695 = vst.msk [vmem:[#allocation2 + $0x20] sm:$0xff] %vm421_vm0, %v688_v47  ;;  %v655_v56 = vld [vmem:[#allocation2 + $0x30] sm:$0xff] }
 0x26d   :  { %v760_v27 = vpop.permute.xlu1 %759 }
 0x26e   :  { %856 = vst.msk [vmem:[#allocation2 + $0x1] sm:$0xff] %vm421_vm0, %v848_v23  ;;  %v781_v49 = vadd.f32 %v760_v27, %v741_v9 }
 0x26f   :  { %v673_v12 = vpop.permute.xlu0 %672  ;;  %v809_v60 = vld [vmem:[#allocation2 + $0x9] sm:$0xff] }
 0x270   :  { %789 = vst.msk [vmem:[#allocation2 + $0x17] sm:$0xff] %vm421_vm0, %v781_v49  ;;  %v689_v0 = vadd.f32 %v673_v12, %v654_v58  ;;  %v849_v16 = vadd.f32 %v827_v59, %v809_v60 }
 0x271   :  { %v831_v8 = vpop.permute.xlu1 %830 }
 0x272   :  { %696 = vst.msk [vmem:[#allocation2 + $0x28] sm:$0xff] %vm421_vm0, %v689_v0  ;;  %857 = vst.msk [vmem:[#allocation2 + $0x9] sm:$0xff] %vm421_vm0, %v849_v16 }
 0x273   :  { %v742_v26 = vld [vmem:[#allocation2 + $0x1f] sm:$0xff]  ;;  %v833_v20 = vpop.permute.xlu0 %832 }
 0x274   :  { %v782_v34 = vadd.f32 %v762_v46, %v742_v26 }
 0x275   :  { %v873_v18 = vld [vmem:[#allocation2] sm:$0xff]  ;;  %v675_v36 = vpop.permute.xlu1 %674 }
 0x276   :  { %v928_v39 = vadd.f32 %v905_v30, %v873_v18  ;;  %790 = vst.msk [vmem:[#allocation2 + $0x1f] sm:$0xff] %vm421_vm0, %v782_v34  ;;  %v690_v41 = vadd.f32 %v675_v36, %v655_v56 }
 0x277   :  { %v766_v17 = vpop.permute.xlu0 %765  ;;  %v810_v37 = vld [vmem:[#allocation2 + $0x11] sm:$0xff] }
 0x278   :  { %936 = vst.msk [vmem:[#allocation2] sm:$0xff] %vm421_vm0, %v928_v39  ;;  %697 = vst.msk [vmem:[#allocation2 + $0x30] sm:$0xff] %vm421_vm0, %v690_v41  ;;  %v850_v59 = vadd.f32 %v829_v55, %v810_v37 }
 0x279   :  { %v764_v5 = vpop.permute.xlu1 %763  ;;  %v743_v44 = vld [vmem:[#allocation2 + $0x27] sm:$0xff] }
 0x27a   :  { %v783_v42 = vadd.f32 %v764_v5, %v743_v44  ;;  %858 = vst.msk [vmem:[#allocation2 + $0x11] sm:$0xff] %vm421_vm0, %v850_v59  ;;  %v874_v23 = vld [vmem:[#allocation2 + $0x8] sm:$0xff] }
 0x27b   :  { %v677_v53 = vpop.permute.xlu0 %676 }
 0x27c   :  { %791 = vst.msk [vmem:[#allocation2 + $0x27] sm:$0xff] %vm421_vm0, %v783_v42  ;;  %v691_v30 = vadd.f32 %v677_v53, %v656_v14 }
 0x27d   :  { %v811_v19 = vld [vmem:[#allocation2 + $0x19] sm:$0xff]  ;;  %v835_v47 = vpop.permute.xlu1 %834 }
 0x27e   :  { %v851_v52 = vadd.f32 %v831_v8, %v811_v19  ;;  %698 = vst.msk [vmem:[#allocation2 + $0x38] sm:$0xff] %vm421_vm0, %v691_v30 }
 0x27f   :  { %v744_v46 = vld [vmem:[#allocation2 + $0x2f] sm:$0xff]  ;;  %v907_v27 = vpop.permute.xlu0 %906  ;;  %v953_v44 = vld [vmem:[#allocation2] sm:$0xff] }
 0x280   :  { %859 = vst.msk [vmem:[#allocation2 + $0x19] sm:$0xff] %vm421_vm0, %v851_v52  ;;  %v784_v55 = vadd.f32 %v766_v17, %v744_v46  ;;  %v929_v9 = vadd.f32 %v907_v27, %v874_v23 }
 0x281   :  { %v875_v49 = vld [vmem:[#allocation2 + $0x10] sm:$0xff]  ;;  %v909_v12 = vpop.permute.xlu1 %908 }
 0x282   :  { %792 = vst.msk [vmem:[#allocation2 + $0x2f] sm:$0xff] %vm421_vm0, %v784_v55  ;;  %937 = vst.msk [vmem:[#allocation2 + $0x8] sm:$0xff] %vm421_vm0, %v929_v9  ;;  %v930_v58 = vadd.f32 %v909_v12, %v875_v49 }
 0x283   :  { %v911_v60 = vpop.permute.xlu0 %910  ;;  %v812_v0 = vld [vmem:[#allocation2 + $0x21] sm:$0xff] }
 0x284   :  { %938 = vst.msk [vmem:[#allocation2 + $0x10] sm:$0xff] %vm421_vm0, %v930_v58  ;;  %v852_v16 = vadd.f32 %v833_v20, %v812_v0 }
 0x285   :  { %v768_v8 = vpop.permute.xlu1 %767  ;;  %v745_v26 = vld [vmem:[#allocation2 + $0x37] sm:$0xff] }
 0x286   :  { %v785_v34 = vadd.f32 %v768_v8, %v745_v26  ;;  %860 = vst.msk [vmem:[#allocation2 + $0x21] sm:$0xff] %vm421_vm0, %v852_v16  ;;  %v746_v26 = vld [vmem:[#allocation2 + $0x3f] sm:$0x1] }
 0x287   :  { %v876_v18 = vld [vmem:[#allocation2 + $0x18] sm:$0xff]  ;;  %v987_v36 = vpop.permute.xlu0 %986 }
 0x288   :  { %v931_v56 = vadd.f32 %v911_v60, %v876_v18  ;;  %793 = vst.msk [vmem:[#allocation2 + $0x37] sm:$0xff] %vm421_vm0, %v785_v34 }
 0x289   :  { %v813_v39 = vld [vmem:[#allocation2 + $0x29] sm:$0xff]  ;;  %v913_v17 = vpop.permute.xlu1 %912 }
 0x28a   :  { %v954_v41 = vld [vmem:[#allocation2 + $0x8] sm:$0xff]  ;;  %v853_v37 = vadd.f32 %v835_v47, %v813_v39  ;;  %939 = vst.msk [vmem:[#allocation2 + $0x18] sm:$0xff] %vm421_vm0, %v931_v56 }
 0x28b   :  { %v1009_v59 = vadd.f32 %v987_v36, %v954_v41  ;;  %v991_v5 = vpop.permute.xlu0 %990  ;;  %v955_v46 = vld [vmem:[#allocation2 + $0x10] sm:$0xff] }
 0x28c   :  { %861 = vst.msk [vmem:[#allocation2 + $0x29] sm:$0xff] %vm421_vm0, %v853_v37 }
 0x28d   :  { %1017 = vst.msk [vmem:[#allocation2 + $0x8] sm:$0xff] %vm421_vm0, %v1009_v59  ;;  %v877_v20 = vld [vmem:[#allocation2 + $0x20] sm:$0xff]  ;;  %v985_v42 = vpop.permute.xlu1 %984 }
 0x28e   :  { %v932_v53 = vadd.f32 %v913_v17, %v877_v20  ;;  %v1008_v14 = vadd.f32 %v985_v42, %v953_v44 }
 0x28f   :  { %v837_v30 = vpop.permute.xlu0 %836  ;;  %v814_v19 = vld [vmem:[#allocation2 + $0x31] sm:$0xff] }
 0x290   :  { %940 = vst.msk [vmem:[#allocation2 + $0x20] sm:$0xff] %vm421_vm0, %v932_v53  ;;  %1016 = vst.msk [vmem:[#allocation2] sm:$0xff] %vm421_vm0, %v1008_v14  ;;  %v854_v47 = vadd.f32 %v837_v30, %v814_v19 }
 0x291   :  { %v956_v52 = vld [vmem:[#allocation2 + $0x18] sm:$0xff]  ;;  %v989_v23 = vpop.permute.xlu1 %988 }
 0x292   :  { %v1011_v27 = vadd.f32 %v991_v5, %v956_v52  ;;  %862 = vst.msk [vmem:[#allocation2 + $0x31] sm:$0xff] %vm421_vm0, %v854_v47  ;;  %v1010_v55 = vadd.f32 %v989_v23, %v955_v46 }
 0x293   :  { %v915_v9 = vpop.permute.xlu0 %914  ;;  %v878_v49 = vld [vmem:[#allocation2 + $0x28] sm:$0xff] }
 0x294   :  { %1019 = vst.msk [vmem:[#allocation2 + $0x18] sm:$0xff] %vm421_vm0, %v1011_v27  ;;  %1018 = vst.msk [vmem:[#allocation2 + $0x10] sm:$0xff] %vm421_vm0, %v1010_v55  ;;  %v933_v12 = vadd.f32 %v915_v9, %v878_v49  ;;  %v1025_v5 = vld [vmem:[#allocation2 + $0x8] sm:$0xff] }
 0x295   :  { %v993_v58 = vpop.permute.xlu1 %992 }
 0x296   :  { %941 = vst.msk [vmem:[#allocation2 + $0x28] sm:$0xff] %vm421_vm0, %v933_v12 }
 0x297   :  { %v957_v60 = vld [vmem:[#allocation2 + $0x20] sm:$0xff]  ;;  %v995_v0 = vpop.permute.xlu0 %994 }
 0x298   :  { %v1012_v16 = vadd.f32 %v993_v58, %v957_v60  ;;  %v1024_v41 = vld [vmem:[#allocation2] sm:$0xff] }
 0x299   :  { %v770_v8 = vpop.permute.xlu1 %769  ;;  %v879_v36 = vld [vmem:[#allocation2 + $0x30] sm:$0xff] }
 0x29a   :  { %1020 = vst.msk [vmem:[#allocation2 + $0x20] sm:$0xff] %vm421_vm0, %v1012_v16  ;;  %v786_v34 = vadd.f32 %v770_v8, %v746_v26 }
 0x29b   :  { %v917_v18 = vpop.permute.xlu0 %916  ;;  %v1026_v47 = vld [vmem:[#allocation2 + $0x10] sm:$0xff]  ;;  %v1027_v55 = vld [vmem:[#allocation2 + $0x18] sm:$0xff] }
 0x29c   :  { %795 = vst.msk [vmem:[#allocation2 + $0x3f] sm:$0x1] %vm794_vm5, %v786_v34  ;;  %v934_v56 = vadd.f32 %v917_v18, %v879_v36 }
 0x29d   :  { %v958_v39 = vld [vmem:[#allocation2 + $0x28] sm:$0xff]  ;;  %v1039_v17 = vpop.permute.xlu1 %1038 }
 0x29e   :  { %v1013_v37 = vadd.f32 %v995_v0, %v958_v39  ;;  %942 = vst.msk [vmem:[#allocation2 + $0x30] sm:$0xff] %vm421_vm0, %v934_v56  ;;  %v1059_v59 = vadd.f32 %v1039_v17, %v1024_v41 }
 0x29f   :  { %v1041_v20 = vpop.permute.xlu0 %1040 }
 0x2a0   :  { %1021 = vst.msk [vmem:[#allocation2 + $0x28] sm:$0xff] %vm421_vm0, %v1013_v37  ;;  %1066 = vst.msk [vmem:[#allocation2] sm:$0xff] %vm421_vm0, %v1059_v59  ;;  %v1060_v44 = vadd.f32 %v1041_v20, %v1025_v5 }
 0x2a1   :  { %v839_v42 = vpop.permute.xlu1 %838  ;;  %v1028_v60 = vld [vmem:[#allocation2 + $0x20] sm:$0xff] }
 0x2a2   :  { %1067 = vst.msk [vmem:[#allocation2 + $0x8] sm:$0xff] %vm421_vm0, %v1060_v44 }
 0x2a3   :  { %v815_v53 = vld [vmem:[#allocation2 + $0x39] sm:$0x7f]  ;;  %v997_v14 = vpop.permute.xlu0 %996 }
 0x2a4   :  { %v855_v30 = vadd.f32 %v839_v42, %v815_v53 }
 0x2a5   :  { %v959_v19 = vld [vmem:[#allocation2 + $0x30] sm:$0xff]  ;;  %v1043_v52 = vpop.permute.xlu1 %1042 }
 0x2a6   :  { %863 = vst.msk [vmem:[#allocation2 + $0x39] sm:$0x7f] %vm648_vm4, %v855_v30  ;;  %v1014_v46 = vadd.f32 %v997_v14, %v959_v19  ;;  %v1061_v23 = vadd.f32 %v1043_v52, %v1026_v47 }
 0x2a7   :  { %v1080_v27 = vld [vmem:[#allocation2] sm:$0xff]  ;;  %v1045_v9 = vpop.permute.xlu0 %1044  ;;  %v1029_v34 = vld [vmem:[#allocation2 + $0x28] sm:$0xff] }
 0x2a8   :  { %v1114_v49 = vadd.f32 %v3047_v3, %v1080_v27  ;;  %1022 = vst.msk [vmem:[#allocation2 + $0x30] sm:$0xff] %vm421_vm0, %v1014_v46  ;;  %1068 = vst.msk [vmem:[#allocation2 + $0x10] sm:$0xff] %vm421_vm0, %v1061_v23  ;;  %v1062_v12 = vadd.f32 %v1045_v9, %v1027_v55 }
 0x2a9   :  { %v1081_v58 = vld [vmem:[#allocation2 + $0x8] sm:$0xff]  ;;  %v1047_v0 = vpop.permute.xlu1 %1046 }
 0x2aa   :  { %1121 = vst.msk [vmem:[#allocation2] sm:$0xff] %vm421_vm0, %v1114_v49  ;;  %v1115_v16 = vadd.f32 %v3041_v48, %v1081_v58  ;;  %1069 = vst.msk [vmem:[#allocation2 + $0x18] sm:$0xff] %vm421_vm0, %v1062_v12  ;;  %v1063_v8 = vadd.f32 %v1047_v0, %v1028_v60 }
 0x2ab   :  { %v1049_v26 = vpop.permute.xlu0 %1048 }
 0x2ac   :  { %1122 = vst.msk [vmem:[#allocation2 + $0x8] sm:$0xff] %vm421_vm0, %v1115_v16  ;;  %1070 = vst.msk [vmem:[#allocation2 + $0x20] sm:$0xff] %vm421_vm0, %v1063_v8  ;;  %v1064_v3 = vadd.f32 %v1049_v26, %v1029_v34  ;;  %v2428_v16 = vld [vmem:[#allocation3] ss:$12 sps:$4 sm:$0xff]  }
 0x2ad   :  { %v919_v18 = vpop.permute.xlu1 %918  ;;  %v880_v36 = vld [vmem:[#allocation2 + $0x38] sm:$0x7f] }
 0x2ae   :  { %1071 = vst.msk [vmem:[#allocation2 + $0x28] sm:$0xff] %vm421_vm0, %v1064_v3  ;;  %v935_v56 = vadd.f32 %v919_v18, %v880_v36  ;;  %v2430_v18 = vld [vmem:[#allocation3 + $0x18] ss:$12 sps:$4 sm:$0xff]  }
 0x2af   :  { %v1082_v39 = vld [vmem:[#allocation2 + $0x10] sm:$0xff]  ;;  %v1051_v41 = vpop.permute.xlu0 %1050 }
 0x2b0   :  { %v1030_v17 = vld [vmem:[#allocation2 + $0x30] sm:$0xff]  ;;  %v1116_v48 = vadd.f32 %v3065_v38, %v1082_v39  ;;  %943 = vst.msk [vmem:[#allocation2 + $0x38] sm:$0x7f] %vm648_vm4, %v935_v56  ;;  %v3648_v56 = vmov 0  }
 0x2b1   :  { %v1065_v37 = vadd.f32 %v1051_v41, %v1030_v17  ;;  %v1083_v59 = vld [vmem:[#allocation2 + $0x18] sm:$0xff]  ;;  %v1128_v5 = vld [vmem:[#allocation2] sm:$0xff]  ;;  %v999_v52 = vpop.permute.xlu1 %998 }
 0x2b2   :  { %1123 = vst.msk [vmem:[#allocation2 + $0x10] sm:$0xff] %vm421_vm0, %v1116_v48  ;;  %v1117_v20 = vadd.f32 %v3074_v21, %v1083_v59  ;;  %v1136_v14 = vmax.f32 %v1128_v5, 0.0 }
 0x2b3   :  { %1072 = vst.msk [vmem:[#allocation2 + $0x30] sm:$0xff] %vm421_vm0, %v1065_v37  ;;  %v1084_v44 = vld [vmem:[#allocation2 + $0x20] sm:$0xff]  ;;  %v1129_v42 = vld [vmem:[#allocation2 + $0x8] sm:$0xff] }
 0x2b4   :  { %1124 = vst.msk [vmem:[#allocation2 + $0x18] sm:$0xff] %vm421_vm0, %v1117_v20  ;;  %v1118_v53 = vadd.f32 %v3077_v1, %v1084_v44  ;;  %v1137_v30 = vmax.f32 %v1129_v42, 0.0 }
 0x2b5   :  { %v1085_v38 = vld [vmem:[#allocation2 + $0x28] sm:$0xff] }
 0x2b6   :  { %1125 = vst.msk [vmem:[#allocation2 + $0x20] sm:$0xff] %vm421_vm0, %v1118_v53  ;;  %v1119_v19 = vadd.f32 %v3070_v11, %v1085_v38  ;;  %v1144_v47 = vpack.c.bf16 %v1137_v30, %v1136_v14 }
 0x2b7   :  { %v960_v46 = vld [vmem:[#allocation2 + $0x38] sm:$0x1] }
 0x2b8   :  { %1126 = vst.msk [vmem:[#allocation2 + $0x28] sm:$0xff] %vm421_vm0, %v1119_v19  ;;  %v1015_v21 = vadd.f32 %v999_v52, %v960_v46  ;;  %2327 = vmatprep.mubr.msk.bf16.mxu0 %vm421_vm0, %v1144_v47 }
 0x2b9   :  { %v1130_v27 = vld [vmem:[#allocation2 + $0x10] sm:$0xff] }
 0x2ba   :  { %v1086_v23 = vld [vmem:[#allocation2 + $0x30] sm:$0x7f]  ;;  %1023 = vst.msk [vmem:[#allocation2 + $0x38] sm:$0x1] %vm794_vm5, %v1015_v21  ;;  %v1138_v9 = vmax.f32 %v1130_v27, 0.0 }
 0x2bb   :  { %v1120_v1 = vadd.f32 %v1105_v61, %v1086_v23  ;;  %v1131_v55 = vld [vmem:[#allocation2 + $0x18] sm:$0xff] }
 0x2bc   :  { %v1139_v11 = vmax.f32 %v1131_v55, 0.0  ;;  %v3281_v55 = vld [vmem:[%s3630_s6] ss:$0 sm:$0xff] }
 0x2bd   :  { %1127 = vst.msk [vmem:[#allocation2 + $0x30] sm:$0x7f] %vm648_vm4, %v1120_v1  ;;  %v1132_v49 = vld [vmem:[#allocation2 + $0x20] sm:$0xff] }
 0x2be   :  { %v1145_v12 = vpack.c.bf16 %v1139_v11, %v1138_v9  ;;  %v1140_v60 = vmax.f32 %v1132_v49, 0.0  ;;  %v2431_v9 = vld [vmem:[%s3624_s0 + $0x8] sm:$0xff]   ;;  %v2432_v49 = vld [vmem:[%s3624_s0] sm:$0xff]  }
 0x2bf   :  { %v1133_v58 = vld [vmem:[#allocation2 + $0x28] sm:$0xff]  ;;  %v1245_v11 = vunpack.c.l.bf16 %v2431_v9 }
 0x2c0   :  { %2328 = vmatmul.mubr.msk.bf16.vlgmr.msra.gmra.mrb[8].mxu0 %vm421_vm0, %v1145_v12  ;;  %v1141_v0 = vmax.f32 %v1133_v58, 0.0  ;;  %v1243_v12 = vunpack.c.l.bf16 %v2432_v49 }
 0x2c1   :  { %1398 = vmatpush1.bf16.msra.mxu0 %v2428_v16  ;;  %v1135_v8 = vld [vmem:[#allocation2 + $0x38] sm:$0xff]  ;;  %v1246_v16 = vunpack.c.h.bf16 %v2431_v9 }
 0x2c2   :  { %v1146_v26 = vpack.c.bf16 %v1141_v0, %v1140_v60  ;;  %1399 = vmatprep.subr.bf16.mxu0 %v2429_v62  ;;  %v1143_v3 = vmax.f32 %v1135_v8, 0.0  ;;  %v1244_v8 = vunpack.c.h.bf16 %v2432_v49 }
 0x2c4   :  { %v1134_v61 = vld [vmem:[#allocation2 + $0x30] sm:$0xff]  ;;  %2331 = vmatprep.mubr.msk.bf16.mxu0 %vm421_vm0, %v1146_v26 }
 0x2c5   :  { %v1142_v34 = vmax.f32 %v1134_v61, 0.0  ;;  %1400 = vmatpush1.bf16.msra.mxu0 %v2430_v18 }
 0x2c6   :  { %2371 = vmatprep.subr.bf16.mxu0 %v3121_v31 }
 0x2c7   :  { %v1147_v36 = vpack.c.bf16 %v1143_v3, %v1142_v34 }
 0x2c9   :  { %2332 = vmatmul.mubr.msk.bf16.gmra.mrb[12].mxu0 %vm421_vm0, %v1147_v36 }
 0x2ca   :  { %1429 = vmatprep.mubr.bf16.mxu0 %v3648_v56 }
 0x2d1   :  { %2227 = vmatmul.mubr.msk.bf16.vlgmr.msra.gmra.mrb[16].mxu0 %vm421_vm0, %v3149_v15 }
 0x2d2   :  { %1439 = vmatprep.mubr.bf16.mxu0 %v3648_v56  ;;  %2372 = vmatpush3.bf16.msra.mxu0 %v3121_v31 }
 0x2d3   :  { %2373 = vmatprep.subr.bf16.mxu0 %v3133_v4 }
 0x2d6   :  { %2374 = vmatpush3.bf16.msra.mxu0 %v3133_v4 }
 0x2d9   :  { %2228 = vmatmul.mubr.msk.bf16.gmra.mrb[20].mxu0 %vm421_vm0, %v3147_v50 }
 0x2da   :  { %1449 = vmatprep.mubr.bf16.mxu0 %v3648_v56 }
 0x2e1   :  { %2229 = vmatmul.mubr.msk.bf16.gmra.mrb[24].mxu0 %vm421_vm0, %v3161_v7 }
 0x2e2   :  { %1459 = vmatprep.mubr.bf16.mxu0 %v3648_v56 }
 0x2e9   :  { %2230 = vmatmul.mubr.msk.bf16.gmra.mrb[28].mxu0 %vm421_vm0, %v3159_v63 }
 0x313   :  { %v2365_v15 = vpop.f32.mrb[32].mxu1 }
 0x314   :  { %v1504_v39 = vpop.f32.mrb[33].mxu1  ;;  %v1963_v4 = vmul.f32 %v2365_v15, %v2707_v13 }
 0x315   :  { %v2366_v31 = vpop.f32.mrb[34].mxu1 }
 0x316   :  { %v1506_v41 = vpop.f32.mrb[35].mxu1  ;;  %v1964_v50 = vmul.f32 %v2366_v31, %v2784_v51  ;;  %v1984_v7 = vrot.slane %v1963_v4, 1 }
 0x317   :  { %v1962_v37 = vmul.f32 %v1506_v41, %v2693_v2 }
 0x318   :  { %v1986_v5 = vrot.slane %v1964_v50, 1 }
 0x319   :  { %v1983_v20 = vrot.slane %v1962_v37, 1  ;;  %v2434_v37 = vld [vmem:[%s3624_s0 + $0x10] sm:$0xff]  }
 0x31a   :  { %v3253_v63 = vsel %vm600_vm9, %v1984_v7, %v1986_v5 }
 0x31b   :  { %v2369_v17 = vpop.f32.mrb[36].mxu1  ;;  %v3256_v42 = vsel %vm600_vm9, %v1983_v20, %v1984_v7 }
 0x31c   :  { %v1519_v48 = vpop.f32.mrb[37].mxu1  ;;  %v1967_v14 = vmul.f32 %v2369_v17, %v2886_v43  ;;  %v2433_v17 = vld [vmem:[%s3624_s0 + $0x18] sm:$0xff]  }
 0x31d   :  { %v1965_v59 = vmul.f32 %v1519_v48, %v2820_v6  ;;  %v2370_v30 = vpop.f32.mrb[38].mxu1  ;;  %v1249_v48 = vunpack.c.l.bf16 %v2433_v17  ;;  %v1250_v20 = vunpack.c.h.bf16 %v2433_v17 }
 0x31e   :  { %v1522_v38 = vpop.f32.mrb[39].mxu1  ;;  %v1992_v19 = vrot.slane %v1967_v14, 1  ;;  %v3263_v47 = vmul.f32 %v2370_v30, %v2956_v32  ;;  %v1248_v30 = vunpack.c.h.bf16 %v2434_v37 }
 0x31f   :  { %v1988_v44 = vrot.slane %v1965_v59, 1  ;;  %v1966_v52 = vmul.f32 %v1522_v38, %v2854_v35  ;;  %v1247_v59 = vunpack.c.l.bf16 %v2434_v37 }
 0x320   :  { %v1994_v46 = vrot.slane %v3263_v47, 1 }
 0x321   :  { %v3259_v53 = vsel %vm600_vm9, %v1986_v5, %v1988_v44  ;;  %v1990_v21 = vrot.slane %v1966_v52, 1 }
 0x322   :  { %v3270_v23 = vsel %vm600_vm9, %v1992_v19, %v1994_v46 }
 0x323   :  { %v3273_v27 = vsel %vm600_vm9, %v1988_v44, %v1990_v21  ;;  %v3276_v1 = vsel %vm600_vm9, %v1990_v21, %v1992_v19 }
 0x393   :  { %v2329_v58 = vpop.f32.mrb[8].mxu0 }
 0x394   :  { %v1221_v60 = vadd.f32 %v2329_v58, %v3281_v55  ;;  %v1212_v0 = vpop.f32.mrb[9].mxu0 }
 0x395   :  { %v1213_v26 = vadd.f32 %v3281_v55, %v1212_v0  ;;  %v2330_v62 = vpop.f32.mrb[10].mxu0 }
 0x396   :  { %v1253_v61 = vadd.f32 %v1245_v11, %v1221_v60  ;;  %v1224_v34 = vadd.f32 %v2330_v62, %v3281_v55  ;;  %v1215_v3 = vpop.f32.mrb[11].mxu0 }
 0x397   :  { %v1251_v18 = vadd.f32 %v1243_v12, %v1213_v26  ;;  %v1216_v36 = vadd.f32 %v3281_v55, %v1215_v3  ;;  %v3307_v26 = vld [vmem:[%s3628_s4] ss:$0 sm:$0xff] }
 0x398   :  { %v1261_v56 = vmax.f32 %v1253_v61, 0.0  ;;  %v1254_v15 = vadd.f32 %v1246_v16, %v1224_v34 }
 0x399   :  { %v1259_v39 = vmax.f32 %v1251_v18, 0.0  ;;  %v1252_v31 = vadd.f32 %v1244_v8, %v1216_v36 }
 0x39a   :  { %1269 = vst [vmem:[#allocation6 + $0x10] sm:$0xff] %v1261_v56  ;;  %v1262_v41 = vmax.f32 %v1254_v15, 0.0 }
 0x39b   :  { %1267 = vst [vmem:[#allocation6] sm:$0xff] %v1259_v39  ;;  %v1260_v4 = vmax.f32 %v1252_v31, 0.0 }
 0x39c   :  { %v2333_v50 = vpop.f32.mrb[12].mxu0  ;;  %1270 = vst [vmem:[#allocation6 + $0x18] sm:$0xff] %v1262_v41 }
 0x39d   :  { %v1237_v7 = vadd.f32 %v2333_v50, %v3281_v55  ;;  %v1228_v5 = vpop.f32.mrb[13].mxu0  ;;  %1268 = vst [vmem:[#allocation6 + $0x8] sm:$0xff] %v1260_v4 }
 0x39e   :  { %v1229_v44 = vadd.f32 %v3281_v55, %v1228_v5  ;;  %v2334_v14 = vpop.f32.mrb[14].mxu0 }
 0x39f   :  { %v1257_v38 = vadd.f32 %v1249_v48, %v1237_v7  ;;  %v1240_v19 = vadd.f32 %v2334_v14, %v3281_v55  ;;  %v1231_v52 = vpop.f32.mrb[15].mxu0 }
 0x3a0   :  { %v1255_v21 = vadd.f32 %v1247_v59, %v1229_v44  ;;  %v1232_v9 = vadd.f32 %v3281_v55, %v1231_v52 }
 0x3a1   :  { %v1265_v11 = vmax.f32 %v1257_v38, 0.0  ;;  %v1258_v49 = vadd.f32 %v1250_v20, %v1240_v19 }
 0x3a2   :  { %v1263_v12 = vmax.f32 %v1255_v21, 0.0  ;;  %v1256_v58 = vadd.f32 %v1248_v30, %v1232_v9 }
 0x3a3   :  { %1273 = vst [vmem:[#allocation6 + $0x30] sm:$0xff] %v1265_v11  ;;  %v1266_v60 = vmax.f32 %v1258_v49, 0.0 }
 0x3a4   :  { %1271 = vst [vmem:[#allocation6 + $0x20] sm:$0xff] %v1263_v12  ;;  %v1264_v0 = vmax.f32 %v1256_v58, 0.0  ;;  %v1431_v16 = vpop.f32.mrb[16].mxu0 }
 0x3a5   :  { %1274 = vst [vmem:[#allocation6 + $0x38] sm:$0xff] %v1266_v60  ;;  %1592 = vrot.lane.b32.xlu0 %v1431_v16, %s2493_s24  ;;  %v1433_v8 = vpop.f32.mrb[17].mxu0  ;;  %v1691_v36 = vmul.f32 %v1431_v16, %v2739_v29 }
 0x3a6   :  { %1272 = vst [vmem:[#allocation6 + $0x28] sm:$0xff] %v1264_v0  ;;  %v1534_v62 = vadd.f32 %v3307_v26, %v1433_v8  ;;  %v1755_v61 = vmul.f32 %v1433_v8, %v2693_v2  ;;  %v1435_v34 = vpop.f32.mrb[18].mxu0  ;;  %v1834_v3 = vmul.f32 %v1433_v8, %v2702_v10  ;;  %v1627_v10 = vmul.f32 %v1431_v16, %v2707_v13 }
 0x3a7   :  { %1594 = vrot.lane.b32.xlu1 %v1435_v34, %s2493_s24  ;;  %v3313_v18 = vpop.f32.mrb[19].mxu0  ;;  %v1628_v17 = vmul.f32 %v1435_v34, %v2784_v51  ;;  %v1550_v8 = vmul.f32 %v1431_v16, %v2722_v22 }
 0x3a8   :  { %1542 = vst.msk [vmem:[#allocation2] sm:$0xff] %vm421_vm0, %v1534_v62  ;;  %v1535_v56 = vadd.f32 %v3307_v26, %v3313_v18  ;;  %v1756_v15 = vmul.f32 %v3313_v18, %v2707_v13  ;;  %v1835_v2 = vmul.f32 %v3313_v18, %v2739_v29  ;;  %v1779_v39 = vrot.slane %v1755_v61, 1 }
 0x3a9   :  { %1715 = vrot.lane.b32.xlu0 %v1691_v36, %s2495_s26  ;;  %v1858_v41 = vrot.slane %v1834_v3, 7  ;;  %v1692_v13 = vmul.f32 %v1435_v34, %v2722_v22 }
 0x3aa   :  { %1543 = vst.msk [vmem:[#allocation2 + $0x8] sm:$0xff] %vm421_vm0, %v1535_v56  ;;  %v1780_v31 = vrot.slane %v1756_v15, 1  ;;  %v1859_v48 = vrot.slane %v1835_v2, 7  ;;  %v1551_v56 = vmul.f32 %v1435_v34, %v2735_v28 }
 0x3ab   :  { %1651 = vrot.lane.b32.xlu1 %v1627_v10, %s2494_s25 }
 0x3ac   :  { %v3328_v4 = vpop.f32.mrb[20].mxu0  ;;  %v1781_v50 = vsel %vm600_vm9, %v1779_v39, %v1780_v31  ;;  %v3336_v37 = vsel %vm707_vm7, %v1858_v41, %v1859_v48 }
 0x3ad   :  { %1653 = vrot.lane.b32.xlu0 %v1628_v17, %s2494_s25  ;;  %v3332_v29 = vpop.f32.mrb[21].mxu0  ;;  %v1693_v11 = vmul.f32 %v3328_v4, %v2735_v28  ;;  %v1629_v34 = vmul.f32 %v3328_v4, %v2820_v6 }
 0x3ae   :  { %v1536_v59 = vadd.f32 %v3307_v26, %v3332_v29  ;;  %v1757_v7 = vmul.f32 %v3332_v29, %v2784_v51  ;;  %v1836_v5 = vmul.f32 %v3332_v29, %v2722_v22  ;;  %v1445_v20 = vpop.f32.mrb[22].mxu0 }
 0x3af   :  { %1717 = vrot.lane.b32.xlu1 %v1692_v13, %s2495_s26  ;;  %v3345_v44 = vpop.f32.mrb[23].mxu0  ;;  %v1630_v22 = vmul.f32 %v1445_v20, %v2854_v35 }
 0x3b0   :  { %1544 = vst.msk [vmem:[#allocation2 + $0x10] sm:$0xff] %vm421_vm0, %v1536_v59  ;;  %v1537_v14 = vadd.f32 %v3307_v26, %v3345_v44  ;;  %v1758_v30 = vmul.f32 %v3345_v44, %v2820_v6  ;;  %v1837_v38 = vmul.f32 %v3345_v44, %v2735_v28  ;;  %v1782_v51 = vrot.slane %v1757_v7, 1 }
 0x3b1   :  { %1596 = vrot.lane.b32.xlu0 %v3328_v4, %s2493_s24  ;;  %v1861_v19 = vrot.slane %v1836_v5, 7 }
 0x3b2   :  { %1545 = vst.msk [vmem:[#allocation2 + $0x18] sm:$0xff] %vm421_vm0, %v1537_v14  ;;  %v3358_v52 = vsel %vm600_vm9, %v1780_v31, %v1782_v51  ;;  %v1784_v21 = vrot.slane %v1758_v30, 1  ;;  %v1863_v9 = vrot.slane %v1837_v38, 7  ;;  %v1694_v30 = vmul.f32 %v1445_v20, %v2848_v33 }
 0x3b3   :  { %1794 = vrot.lane.b32.xlu1 %v1781_v50, %s2493_s24  ;;  %v3364_v49 = vsel %vm707_vm7, %v1859_v48, %v1861_v19  ;;  %v1552_v38 = vmul.f32 %v3328_v4, %v2848_v33 }
 0x3b4   :  { %v3366_v12 = vpop.f32.mrb[24].mxu0  ;;  %v3369_v58 = vsel %vm600_vm9, %v1782_v51, %v1784_v21  ;;  %v3372_v60 = vsel %vm707_vm7, %v1861_v19, %v1863_v9 }
 0x3b5   :  { %1719 = vrot.lane.b32.xlu0 %v1693_v11, %s2495_s26  ;;  %v3375_v0 = vpop.f32.mrb[25].mxu0  ;;  %v1553_v11 = vmul.f32 %v1445_v20, %v2875_v40 }
 0x3b6   :  { %v1538_v62 = vadd.f32 %v3307_v26, %v3375_v0  ;;  %v1759_v61 = vmul.f32 %v3375_v0, %v2854_v35  ;;  %v1838_v3 = vmul.f32 %v3375_v0, %v2848_v33  ;;  %v3384_v36 = vpop.f32.mrb[26].mxu0  ;;  %v1695_v33 = vmul.f32 %v3366_v12, %v2875_v40 }
 0x3b7   :  { %v1557_v15 = vld [vmem:[#allocation2 + $0x9] sm:$0xff]  ;;  %1598 = vrot.lane.b32.xlu1 %v1445_v20, %s2493_s24  ;;  %v3388_v2 = vpop.f32.mrb[27].mxu0 }
 0x3b8   :  { %v1564_v16 = vadd.f32 %v1557_v15, %v1550_v8  ;;  %1546 = vst.msk [vmem:[#allocation2 + $0x20] sm:$0xff] %vm421_vm0, %v1538_v62  ;;  %v1539_v10 = vadd.f32 %v3307_v26, %v3388_v2  ;;  %v1760_v39 = vmul.f32 %v3388_v2, %v2886_v43  ;;  %v1839_v31 = vmul.f32 %v3388_v2, %v2875_v40 }
 0x3b9   :  { %v1558_v28 = vld [vmem:[#allocation2 + $0x11] sm:$0xff]  ;;  %1657 = vrot.lane.b32.xlu0 %v1630_v22, %s2494_s25  ;;  %v1786_v41 = vrot.slane %v1759_v61, 1  ;;  %v1865_v35 = vrot.slane %v1838_v3, 7 }
 0x3ba   :  { %1571 = vst.msk [vmem:[#allocation2 + $0x9] sm:$0xff] %vm421_vm0, %v1564_v16  ;;  %v1565_v17 = vadd.f32 %v1558_v28, %v1551_v56  ;;  %1547 = vst.msk [vmem:[#allocation2 + $0x28] sm:$0xff] %vm421_vm0, %v1539_v10  ;;  %v1788_v48 = vrot.slane %v1760_v39, 1  ;;  %v1867_v50 = vrot.slane %v1839_v31, 7  ;;  %v1632_v10 = vmul.f32 %v3384_v36, %v2956_v32 }
 0x3bb   :  { %1655 = vrot.lane.b32.xlu1 %v1629_v34, %s2494_s25  ;;  %v1787_v13 = vsel %vm600_vm9, %v1784_v21, %v1786_v41  ;;  %v3406_v59 = vsel %vm707_vm7, %v1863_v9, %v1865_v35 }
 0x3bc   :  { %1572 = vst.msk [vmem:[#allocation2 + $0x11] sm:$0xff] %vm421_vm0, %v1565_v17  ;;  %v3409_v7 = vpop.f32.mrb[28].mxu0  ;;  %v1789_v6 = vsel %vm600_vm9, %v1786_v41, %v1788_v48  ;;  %v3413_v5 = vsel %vm707_vm7, %v1865_v35, %v1867_v50  ;;  %v1631_v41 = vmul.f32 %v3366_v12, %v2886_v43  ;;  %v1554_v35 = vmul.f32 %v3366_v12, %v2947_v45 }
 0x3bd   :  { %1600 = vrot.lane.b32.xlu0 %v3366_v12, %s2493_s24  ;;  %v3417_v14 = vpop.f32.mrb[29].mxu0 }
 0x3be   :  { %v1540_v51 = vadd.f32 %v3307_v26, %v3417_v14  ;;  %v1761_v19 = vmul.f32 %v3417_v14, %v2956_v32  ;;  %v1840_v21 = vmul.f32 %v3417_v14, %v2947_v45  ;;  %v3428_v9 = vpop.f32.mrb[30].mxu0  ;;  %v1555_v32 = vmul.f32 %v3384_v36, %v2974_v54 }
 0x3bf   :  { %v1559_v8 = vld [vmem:[#allocation2 + $0x19] sm:$0xff]  ;;  %1721 = vrot.lane.b32.xlu1 %v1694_v30, %s2495_s26  ;;  %v3432_v62 = vpop.f32.mrb[31].mxu0  ;;  %v1696_v30 = vmul.f32 %v3384_v36, %v2947_v45  ;;  %v1633_v45 = vmul.f32 %v3409_v7, %v2981_v57 }
 0x3c0   :  { %v1566_v4 = vadd.f32 %v1559_v8, %v1552_v38  ;;  %1548 = vst.msk [vmem:[#allocation2 + $0x30] sm:$0xff] %vm421_vm0, %v1540_v51  ;;  %v1541_v61 = vadd.f32 %v3307_v26, %v3432_v62  ;;  %v3441_v3 = vmul.f32 %v3432_v62, %v2981_v57  ;;  %v3445_v20 = vmul.f32 %v3432_v62, %v2974_v54 }
 0x3c1   :  { %v1560_v56 = vld [vmem:[#allocation2 + $0x21] sm:$0xff]  ;;  %1723 = vrot.lane.b32.xlu0 %v1695_v33, %s2495_s26  ;;  %v1790_v15 = vrot.slane %v1761_v19, 1  ;;  %v1869_v22 = vrot.slane %v1840_v21, 7  ;;  %v1634_v57 = vmul.f32 %v3428_v9, %v2927_v25 }
 0x3c2   :  { %1573 = vst.msk [vmem:[#allocation2 + $0x19] sm:$0xff] %vm421_vm0, %v1566_v4  ;;  %v1567_v40 = vadd.f32 %v1560_v56, %v1553_v11  ;;  %1549 = vst.msk [vmem:[#allocation2 + $0x38] sm:$0xff] %vm421_vm0, %v1541_v61  ;;  %v1792_v26 = vrot.slane %v3441_v3, 1  ;;  %v1871_v16 = vrot.slane %v3445_v20, 7  ;;  %v1578_v25 = vld [vmem:[#allocation2 + $0x8] sm:$0xff] }
 0x3c3   :  { %1602 = vrot.lane.b32.xlu1 %v3384_v36, %s2493_s24  ;;  %v1791_v39 = vsel %vm600_vm9, %v1788_v48, %v1790_v15  ;;  %v1870_v31 = vsel %vm707_vm7, %v1867_v50, %v1869_v22  ;;  %v1556_v48 = vmul.f32 %v3409_v7, %v2924_v24 }
 0x3c4   :  { %1574 = vst.msk [vmem:[#allocation2 + $0x21] sm:$0xff] %vm421_vm0, %v1567_v40  ;;  %v1793_v28 = vsel %vm600_vm9, %v1790_v15, %v1792_v26  ;;  %v1872_v34 = vsel %vm707_vm7, %v1869_v22, %v1871_v16 }
 0x3c5   :  { %1661 = vrot.lane.b32.xlu0 %v1632_v10, %s2494_s25 }
 0x3c7   :  { %v1561_v17 = vld [vmem:[#allocation2 + $0x29] sm:$0xff]  ;;  %1659 = vrot.lane.b32.xlu1 %v1631_v41, %s2494_s25 }
 0x3c8   :  { %v1568_v50 = vadd.f32 %v1561_v17, %v1554_v35 }
 0x3c9   :  { %1604 = vrot.lane.b32.xlu0 %v3409_v7, %s2493_s24  ;;  %v1562_v43 = vld [vmem:[#allocation2 + $0x31] sm:$0xff]  ;;  %v1563_v38 = vld [vmem:[#allocation2 + $0x39] sm:$0x7f] }
 0x3ca   :  { %1575 = vst.msk [vmem:[#allocation2 + $0x29] sm:$0xff] %vm421_vm0, %v1568_v50  ;;  %v1569_v12 = vadd.f32 %v1562_v43, %v1555_v32  ;;  %v1570_v51 = vadd.f32 %v1563_v38, %v1556_v48 }
 0x3cb   :  { %1725 = vrot.lane.b32.xlu1 %v1696_v30, %s2495_s26 }
 0x3cc   :  { %1576 = vst.msk [vmem:[#allocation2 + $0x31] sm:$0xff] %vm421_vm0, %v1569_v12 }
 0x3cd   :  { %1577 = vst.msk [vmem:[#allocation2 + $0x39] sm:$0x7f] %vm648_vm4, %v1570_v51  ;;  %1796 = vrot.lane.b32.xlu0 %v3358_v52, %s2493_s24  ;;  %v1697_v52 = vmul.f32 %v3409_v7, %v2974_v54  ;;  %v1698_v54 = vmul.f32 %v3428_v9, %v2924_v24  ;;  %v1580_v7 = vld [vmem:[#allocation2 + $0x18] sm:$0xff]  ;;  %v1581_v9 = vld [vmem:[#allocation2 + $0x20] sm:$0xff] }
 0x3cf   :  { %1798 = vrot.lane.b32.xlu1 %v3369_v58, %s2493_s24 }
 0x3d1   :  { %1800 = vrot.lane.b32.xlu0 %v1787_v13, %s2493_s24  ;;  %v1582_v22 = vld [vmem:[#allocation2 + $0x28] sm:$0xff] }
 0x3d3   :  { %1663 = vrot.lane.b32.xlu1 %v1633_v45, %s2494_s25 }
 0x3d4   :  { %v1584_v12 = vld [vmem:[#allocation2 + $0x38] sm:$0xff] }
 0x3d5   :  { %1875 = vrot.lane.b32.xlu0 %v3364_v49, %s2494_s25 }
 0x3d7   :  { %1802 = vrot.lane.b32.xlu1 %v1789_v6, %s2493_s24 }
 0x3d9   :  { %1879 = vrot.lane.b32.xlu0 %v3406_v59, %s2494_s25 }
 0x3db   :  { %1873 = vrot.lane.b32.xlu1 %v3336_v37, %s2494_s25  ;;  %v1579_v37 = vld [vmem:[#allocation2 + $0x10] sm:$0xff] }
 0x3dd   :  { %1727 = vrot.lane.b32.xlu0 %v1697_v52, %s2495_s26 }
 0x3df   :  { %1877 = vrot.lane.b32.xlu1 %v3372_v60, %s2494_s25 }
 0x3e1   :  { %1804 = vrot.lane.b32.xlu0 %v1791_v39, %s2493_s24 }
 0x3e3   :  { %1881 = vrot.lane.b32.xlu1 %v3413_v5, %s2494_s25 }
 0x3e5   :  { %1883 = vrot.lane.b32.xlu0 %v1870_v31, %s2494_s25 }
 0x3e7   :  { %1665 = vrot.lane.b32.xlu1 %v1634_v57, %s2494_s25 }
 0x3e9   :  { %1806 = vrot.lane.b32.xlu0 %v1793_v28, %s2493_s24 }
 0x3eb   :  { %1927 = vrot.lane.b32.xlu1 %v3313_v18, %s2495_s26 }
 0x3ed   :  { %1929 = vrot.lane.b32.xlu0 %v3332_v29, %s2495_s26 }
 0x3ef   :  { %1729 = vrot.lane.b32.xlu1 %v1698_v54, %s2495_s26 }
 0x3f1   :  { %1885 = vrot.lane.b32.xlu0 %v1872_v34, %s2494_s25  ;;  %v1583_v34 = vld [vmem:[#allocation2 + $0x30] sm:$0xff] }
 0x3f3   :  { %1931 = vrot.lane.b32.xlu1 %v3345_v44, %s2495_s26 }
 0x3f5   :  { %1933 = vrot.lane.b32.xlu0 %v3375_v0, %s2495_s26 }
 0x3f7   :  { %1935 = vrot.lane.b32.xlu1 %v3388_v2, %s2495_s26 }
 0x3f9   :  { %1937 = vrot.lane.b32.xlu0 %v3417_v14, %s2495_s26 }
 0x3fb   :  { %1808 = vrot.lane.b32.xlu1 %v1792_v26, %s2493_s24 }
 0x3fd   :  { %1939 = vrot.lane.b32.xlu0 %v3432_v62, %s2495_s26 }
 0x3ff   :  { %1887 = vrot.lane.b32.xlu1 %v1871_v16, %s2494_s25 }
 0x417   :  { %v1593_v24 = vpop.permute.xlu0 %1592 }
 0x418   :  { %v1613_v18 = vadd.f32 %v1593_v24, %v1578_v25 }
 0x419   :  { %v1595_v29 = vpop.permute.xlu1 %1594 }
 0x41a   :  { %1620 = vst.msk [vmem:[#allocation2 + $0x8] sm:$0xff] %vm421_vm0, %v1613_v18  ;;  %v1614_v44 = vadd.f32 %v1595_v29, %v1579_v37 }
 0x41b   :  { %v1716_v49 = vpop.permute.xlu0 %1715 }
 0x41c   :  { %1621 = vst.msk [vmem:[#allocation2 + $0x10] sm:$0xff] %vm421_vm0, %v1614_v44 }
 0x41d   :  { %v1652_v58 = vpop.permute.xlu1 %1651 }
 0x41f   :  { %v1654_v60 = vpop.permute.xlu0 %1653 }
 0x421   :  { %v1635_v0 = vld [vmem:[#allocation2 + $0x7] sm:$0xff]  ;;  %v1718_v36 = vpop.permute.xlu1 %1717 }
 0x422   :  { %v1675_v2 = vadd.f32 %v1652_v58, %v1635_v0 }
 0x423   :  { %v1636_v13 = vld [vmem:[#allocation2 + $0xf] sm:$0xff]  ;;  %v1597_v59 = vpop.permute.xlu0 %1596 }
 0x424   :  { %1683 = vst.msk [vmem:[#allocation2 + $0x7] sm:$0xff] %vm421_vm0, %v1675_v2  ;;  %v1676_v6 = vadd.f32 %v1654_v60, %v1636_v13  ;;  %v1615_v5 = vadd.f32 %v1597_v59, %v1580_v7 }
 0x425   :  { %v1795_v14 = vpop.permute.xlu1 %1794 }
 0x426   :  { %1684 = vst.msk [vmem:[#allocation2 + $0xf] sm:$0xff] %vm421_vm0, %v1676_v6  ;;  %1622 = vst.msk [vmem:[#allocation2 + $0x18] sm:$0xff] %vm421_vm0, %v1615_v5 }
 0x427   :  { %v1720_v19 = vpop.permute.xlu0 %1719 }
 0x429   :  { %v1599_v21 = vpop.permute.xlu1 %1598 }
 0x42a   :  { %v1616_v11 = vadd.f32 %v1599_v21, %v1581_v9 }
 0x42b   :  { %v1699_v8 = vld [vmem:[#allocation2 + $0x1] sm:$0xff]  ;;  %v1658_v62 = vpop.permute.xlu0 %1657 }
 0x42c   :  { %v1739_v33 = vadd.f32 %v1716_v49, %v1699_v8  ;;  %1623 = vst.msk [vmem:[#allocation2 + $0x20] sm:$0xff] %vm421_vm0, %v1616_v11 }
 0x42d   :  { %v1700_v4 = vld [vmem:[#allocation2 + $0x9] sm:$0xff]  ;;  %v1656_v61 = vpop.permute.xlu1 %1655  ;;  %v1637_v3 = vld [vmem:[#allocation2 + $0x17] sm:$0xff] }
 0x42e   :  { %v1740_v20 = vadd.f32 %v1718_v36, %v1700_v4  ;;  %1747 = vst.msk [vmem:[#allocation2 + $0x1] sm:$0xff] %vm421_vm0, %v1739_v33  ;;  %v1677_v56 = vadd.f32 %v1656_v61, %v1637_v3 }
 0x42f   :  { %v1601_v15 = vpop.permute.xlu0 %1600 }
 0x430   :  { %1748 = vst.msk [vmem:[#allocation2 + $0x9] sm:$0xff] %vm421_vm0, %v1740_v20  ;;  %1685 = vst.msk [vmem:[#allocation2 + $0x17] sm:$0xff] %vm421_vm0, %v1677_v56  ;;  %v1617_v40 = vadd.f32 %v1601_v15, %v1582_v22 }
 0x431   :  { %v1722_v26 = vpop.permute.xlu1 %1721 }
 0x432   :  { %1624 = vst.msk [vmem:[#allocation2 + $0x28] sm:$0xff] %vm421_vm0, %v1617_v40 }
 0x433   :  { %v1638_v16 = vld [vmem:[#allocation2 + $0x1f] sm:$0xff]  ;;  %v1724_v10 = vpop.permute.xlu0 %1723 }
 0x434   :  { %v1678_v39 = vadd.f32 %v1658_v62, %v1638_v16 }
 0x435   :  { %v1763_v31 = vld [vmem:[#allocation2] sm:$0xff]  ;;  %v1603_v28 = vpop.permute.xlu1 %1602 }
 0x436   :  { %v1818_v41 = vadd.f32 %v1795_v14, %v1763_v31  ;;  %1686 = vst.msk [vmem:[#allocation2 + $0x1f] sm:$0xff] %vm421_vm0, %v1678_v39  ;;  %v1618_v35 = vadd.f32 %v1603_v28, %v1583_v34 }
 0x437   :  { %v1662_v17 = vpop.permute.xlu0 %1661  ;;  %v1701_v32 = vld [vmem:[#allocation2 + $0x11] sm:$0xff]  ;;  %v1764_v24 = vld [vmem:[#allocation2 + $0x8] sm:$0xff] }
 0x438   :  { %1826 = vst.msk [vmem:[#allocation2] sm:$0xff] %vm421_vm0, %v1818_v41  ;;  %1625 = vst.msk [vmem:[#allocation2 + $0x30] sm:$0xff] %vm421_vm0, %v1618_v35  ;;  %v1741_v48 = vadd.f32 %v1720_v19, %v1701_v32 }
 0x439   :  { %v1660_v50 = vpop.permute.xlu1 %1659  ;;  %v1639_v30 = vld [vmem:[#allocation2 + $0x27] sm:$0xff] }
 0x43a   :  { %v1679_v43 = vadd.f32 %v1660_v50, %v1639_v30  ;;  %1749 = vst.msk [vmem:[#allocation2 + $0x11] sm:$0xff] %vm421_vm0, %v1741_v48 }
 0x43b   :  { %v1605_v38 = vpop.permute.xlu0 %1604 }
 0x43c   :  { %1687 = vst.msk [vmem:[#allocation2 + $0x27] sm:$0xff] %vm421_vm0, %v1679_v43  ;;  %v1619_v51 = vadd.f32 %v1605_v38, %v1584_v12 }
 0x43d   :  { %v1702_v45 = vld [vmem:[#allocation2 + $0x19] sm:$0xff]  ;;  %v1726_v52 = vpop.permute.xlu1 %1725 }
 0x43e   :  { %v1742_v57 = vadd.f32 %v1722_v26, %v1702_v45  ;;  %1626 = vst.msk [vmem:[#allocation2 + $0x38] sm:$0xff] %vm421_vm0, %v1619_v51 }
 0x43f   :  { %v1640_v54 = vld [vmem:[#allocation2 + $0x2f] sm:$0xff]  ;;  %v1797_v25 = vpop.permute.xlu0 %1796  ;;  %v1842_v62 = vld [vmem:[#allocation2] sm:$0xff] }
 0x440   :  { %1750 = vst.msk [vmem:[#allocation2 + $0x19] sm:$0xff] %vm421_vm0, %v1742_v57  ;;  %v1680_v18 = vadd.f32 %v1662_v17, %v1640_v54  ;;  %v1819_v29 = vadd.f32 %v1797_v25, %v1764_v24 }
 0x441   :  { %v1765_v37 = vld [vmem:[#allocation2 + $0x10] sm:$0xff]  ;;  %v1799_v44 = vpop.permute.xlu1 %1798 }
 0x442   :  { %1688 = vst.msk [vmem:[#allocation2 + $0x2f] sm:$0xff] %vm421_vm0, %v1680_v18  ;;  %1827 = vst.msk [vmem:[#allocation2 + $0x8] sm:$0xff] %vm421_vm0, %v1819_v29  ;;  %v1820_v49 = vadd.f32 %v1799_v44, %v1765_v37 }
 0x443   :  { %v1801_v58 = vpop.permute.xlu0 %1800  ;;  %v1703_v60 = vld [vmem:[#allocation2 + $0x21] sm:$0xff] }
 0x444   :  { %1828 = vst.msk [vmem:[#allocation2 + $0x10] sm:$0xff] %vm421_vm0, %v1820_v49  ;;  %v1743_v0 = vadd.f32 %v1724_v10, %v1703_v60 }
 0x445   :  { %v1664_v36 = vpop.permute.xlu1 %1663  ;;  %v1641_v2 = vld [vmem:[#allocation2 + $0x37] sm:$0xff]  ;;  %v1642_v32 = vld [vmem:[#allocation2 + $0x3f] sm:$0x1] }
 0x446   :  { %v1681_v13 = vadd.f32 %v1664_v36, %v1641_v2  ;;  %1751 = vst.msk [vmem:[#allocation2 + $0x21] sm:$0xff] %vm421_vm0, %v1743_v0 }
 0x447   :  { %v1766_v59 = vld [vmem:[#allocation2 + $0x18] sm:$0xff]  ;;  %v1876_v7 = vpop.permute.xlu0 %1875 }
 0x448   :  { %v1821_v6 = vadd.f32 %v1801_v58, %v1766_v59  ;;  %1689 = vst.msk [vmem:[#allocation2 + $0x37] sm:$0xff] %vm421_vm0, %v1681_v13 }
 0x449   :  { %v1704_v5 = vld [vmem:[#allocation2 + $0x29] sm:$0xff]  ;;  %v1803_v19 = vpop.permute.xlu1 %1802 }
 0x44a   :  { %v1843_v14 = vld [vmem:[#allocation2 + $0x8] sm:$0xff]  ;;  %v1744_v21 = vadd.f32 %v1726_v52, %v1704_v5  ;;  %1829 = vst.msk [vmem:[#allocation2 + $0x18] sm:$0xff] %vm421_vm0, %v1821_v6 }
 0x44b   :  { %v1898_v9 = vadd.f32 %v1876_v7, %v1843_v14  ;;  %v1880_v11 = vpop.permute.xlu0 %1879  ;;  %v1844_v22 = vld [vmem:[#allocation2 + $0x10] sm:$0xff] }
 0x44c   :  { %1752 = vst.msk [vmem:[#allocation2 + $0x29] sm:$0xff] %vm421_vm0, %v1744_v21 }
 0x44d   :  { %1906 = vst.msk [vmem:[#allocation2 + $0x8] sm:$0xff] %vm421_vm0, %v1898_v9  ;;  %v1767_v8 = vld [vmem:[#allocation2 + $0x20] sm:$0xff]  ;;  %v1874_v33 = vpop.permute.xlu1 %1873 }
 0x44e   :  { %v1822_v4 = vadd.f32 %v1803_v19, %v1767_v8  ;;  %v1897_v61 = vadd.f32 %v1874_v33, %v1842_v62 }
 0x44f   :  { %v1728_v3 = vpop.permute.xlu0 %1727  ;;  %v1705_v20 = vld [vmem:[#allocation2 + $0x31] sm:$0xff] }
 0x450   :  { %1830 = vst.msk [vmem:[#allocation2 + $0x20] sm:$0xff] %vm421_vm0, %v1822_v4  ;;  %1905 = vst.msk [vmem:[#allocation2] sm:$0xff] %vm421_vm0, %v1897_v61  ;;  %v1745_v56 = vadd.f32 %v1728_v3, %v1705_v20 }
 0x451   :  { %v1845_v15 = vld [vmem:[#allocation2 + $0x18] sm:$0xff]  ;;  %v1878_v40 = vpop.permute.xlu1 %1877 }
 0x452   :  { %v1900_v26 = vadd.f32 %v1880_v11, %v1845_v15  ;;  %1753 = vst.msk [vmem:[#allocation2 + $0x31] sm:$0xff] %vm421_vm0, %v1745_v56  ;;  %v1899_v16 = vadd.f32 %v1878_v40, %v1844_v22 }
 0x453   :  { %v1805_v10 = vpop.permute.xlu0 %1804  ;;  %v1768_v39 = vld [vmem:[#allocation2 + $0x28] sm:$0xff] }
 0x454   :  { %1908 = vst.msk [vmem:[#allocation2 + $0x18] sm:$0xff] %vm421_vm0, %v1900_v26  ;;  %1907 = vst.msk [vmem:[#allocation2 + $0x10] sm:$0xff] %vm421_vm0, %v1899_v16  ;;  %v1823_v31 = vadd.f32 %v1805_v10, %v1768_v39  ;;  %v1914_v57 = vld [vmem:[#allocation2 + $0x8] sm:$0xff] }
 0x455   :  { %v1882_v28 = vpop.permute.xlu1 %1881 }
 0x456   :  { %1831 = vst.msk [vmem:[#allocation2 + $0x28] sm:$0xff] %vm421_vm0, %v1823_v31 }
 0x457   :  { %v1846_v34 = vld [vmem:[#allocation2 + $0x20] sm:$0xff]  ;;  %v1884_v41 = vpop.permute.xlu0 %1883 }
 0x458   :  { %v1901_v35 = vadd.f32 %v1882_v28, %v1846_v34  ;;  %v1913_v12 = vld [vmem:[#allocation2] sm:$0xff] }
 0x459   :  { %v1666_v17 = vpop.permute.xlu1 %1665  ;;  %v1769_v30 = vld [vmem:[#allocation2 + $0x30] sm:$0xff] }
 0x45a   :  { %1909 = vst.msk [vmem:[#allocation2 + $0x20] sm:$0xff] %vm421_vm0, %v1901_v35  ;;  %v1682_v48 = vadd.f32 %v1666_v17, %v1642_v32 }
 0x45b   :  { %v1807_v50 = vpop.permute.xlu0 %1806  ;;  %v1915_v49 = vld [vmem:[#allocation2 + $0x10] sm:$0xff]  ;;  %v1916_v2 = vld [vmem:[#allocation2 + $0x18] sm:$0xff] }
 0x45c   :  { %1690 = vst.msk [vmem:[#allocation2 + $0x3f] sm:$0x1] %vm794_vm5, %v1682_v48  ;;  %v1824_v43 = vadd.f32 %v1807_v50, %v1769_v30 }
 0x45d   :  { %v1847_v38 = vld [vmem:[#allocation2 + $0x28] sm:$0xff]  ;;  %v1928_v51 = vpop.permute.xlu1 %1927 }
 0x45e   :  { %v1902_v45 = vadd.f32 %v1884_v41, %v1847_v38  ;;  %1832 = vst.msk [vmem:[#allocation2 + $0x30] sm:$0xff] %vm421_vm0, %v1824_v43  ;;  %v1948_v52 = vadd.f32 %v1928_v51, %v1913_v12 }
 0x45f   :  { %v1930_v54 = vpop.permute.xlu0 %1929 }
 0x460   :  { %1910 = vst.msk [vmem:[#allocation2 + $0x28] sm:$0xff] %vm421_vm0, %v1902_v45  ;;  %1955 = vst.msk [vmem:[#allocation2] sm:$0xff] %vm421_vm0, %v1948_v52  ;;  %v1949_v24 = vadd.f32 %v1930_v54, %v1914_v57  ;;  %v2436_v54 = vld [vmem:[%s3624_s0 + $0x28] sm:$0xff]  }
 0x461   :  { %v1730_v25 = vpop.permute.xlu1 %1729  ;;  %v1917_v5 = vld [vmem:[#allocation2 + $0x20] sm:$0xff] }
 0x462   :  { %1956 = vst.msk [vmem:[#allocation2 + $0x8] sm:$0xff] %vm421_vm0, %v1949_v24  ;;  %v2116_v24 = vunpack.c.l.bf16 %v2436_v54 }
 0x463   :  { %v1706_v18 = vld [vmem:[#allocation2 + $0x39] sm:$0x7f]  ;;  %v1886_v29 = vpop.permute.xlu0 %1885 }
 0x464   :  { %v1746_v37 = vadd.f32 %v1730_v25, %v1706_v18  ;;  %v2437_v18 = vld [vmem:[%s3624_s0 + $0x20] sm:$0xff]  }
 0x465   :  { %v1848_v44 = vld [vmem:[#allocation2 + $0x30] sm:$0xff]  ;;  %v1932_v58 = vpop.permute.xlu1 %1931 }
 0x466   :  { %1754 = vst.msk [vmem:[#allocation2 + $0x39] sm:$0x7f] %vm648_vm4, %v1746_v37  ;;  %v1903_v60 = vadd.f32 %v1886_v29, %v1848_v44  ;;  %v1950_v0 = vadd.f32 %v1932_v58, %v1915_v49  ;;  %v2114_v29 = vunpack.c.l.bf16 %v2437_v18  ;;  %v2117_v49 = vunpack.c.h.bf16 %v2436_v54 }
 0x467   :  { %v1969_v36 = vld [vmem:[#allocation2] sm:$0xff]  ;;  %v1934_v13 = vpop.permute.xlu0 %1933  ;;  %v1918_v11 = vld [vmem:[#allocation2 + $0x28] sm:$0xff] }
 0x468   :  { %v2003_v59 = vadd.f32 %v3256_v42, %v1969_v36  ;;  %1911 = vst.msk [vmem:[#allocation2 + $0x30] sm:$0xff] %vm421_vm0, %v1903_v60  ;;  %1957 = vst.msk [vmem:[#allocation2 + $0x10] sm:$0xff] %vm421_vm0, %v1950_v0  ;;  %v1951_v7 = vadd.f32 %v1934_v13, %v1916_v2  ;;  %v2115_v0 = vunpack.c.h.bf16 %v2437_v18 }
 0x469   :  { %v1970_v6 = vld [vmem:[#allocation2 + $0x8] sm:$0xff]  ;;  %v1936_v14 = vpop.permute.xlu1 %1935 }
 0x46a   :  { %2010 = vst.msk [vmem:[#allocation2] sm:$0xff] %vm421_vm0, %v2003_v59  ;;  %v2004_v19 = vadd.f32 %v3253_v63, %v1970_v6  ;;  %1958 = vst.msk [vmem:[#allocation2 + $0x18] sm:$0xff] %vm421_vm0, %v1951_v7  ;;  %v1952_v21 = vadd.f32 %v1936_v14, %v1917_v5 }
 0x46b   :  { %v1938_v9 = vpop.permute.xlu0 %1937 }
 0x46c   :  { %2011 = vst.msk [vmem:[#allocation2 + $0x8] sm:$0xff] %vm421_vm0, %v2004_v19  ;;  %1959 = vst.msk [vmem:[#allocation2 + $0x20] sm:$0xff] %vm421_vm0, %v1952_v21  ;;  %v1953_v42 = vadd.f32 %v1938_v9, %v1918_v11  ;;  %v2438_v9 = vld [vmem:[%s3624_s0 + $0x38] sm:$0xff]  }
 0x46d   :  { %v1809_v8 = vpop.permute.xlu1 %1808  ;;  %v1770_v62 = vld [vmem:[#allocation2 + $0x38] sm:$0x7f]  ;;  %v2120_v11 = vunpack.c.l.bf16 %v2438_v9 }
 0x46e   :  { %1960 = vst.msk [vmem:[#allocation2 + $0x28] sm:$0xff] %vm421_vm0, %v1953_v42  ;;  %v1825_v33 = vadd.f32 %v1809_v8, %v1770_v62  ;;  %v2439_v62 = vld [vmem:[%s3624_s0 + $0x30] sm:$0xff]   ;;  %s2496_s0 = smov [#allocation6]  }
 0x46f   :  { %v1971_v4 = vld [vmem:[#allocation2 + $0x10] sm:$0xff]  ;;  %v1940_v61 = vpop.permute.xlu0 %1939  ;;  %s2152_s22 = sshll.u32 %s2496_s0, 4  ;;  %s2153_s22 = int_to_ptr.vmem [resolvable:$true] %s2152_s22 }
 0x470   :  { %v1919_v3 = vld [vmem:[#allocation2 + $0x30] sm:$0xff]  ;;  %v2005_v63 = vadd.f32 %v3259_v53, %v1971_v4  ;;  %1833 = vst.msk [vmem:[#allocation2 + $0x38] sm:$0x7f] %vm648_vm4, %v1825_v33  ;;  %v2118_v33 = vunpack.c.l.bf16 %v2439_v62  ;;  %s2462_s23 = scalar_lea.vmem %s2153_s22, 2048  ;;  %p2467_p9 = scmp.lt.s32.totalorder %s2153_s22, %s2153_s22 }
 0x471   :  { %v1954_v20 = vadd.f32 %v1940_v61, %v1919_v3  ;;  %v1972_v56 = vld [vmem:[#allocation2 + $0x18] sm:$0xff]  ;;  %v2017_v15 = vld [vmem:[#allocation2] sm:$0xff]  ;;  %v1888_v34 = vpop.permute.xlu1 %1887  ;;  %v2121_v3 = vunpack.c.h.bf16 %v2438_v9  ;;  %p2463_p8 = scmp.ne.s32.totalorder %s2153_s22, %s2462_s23  ;;  %p2468_p10 = scmp.lt.s32.totalorder %s2462_s23, %s2462_s23 }
 0x472   :  { %2012 = vst.msk [vmem:[#allocation2 + $0x10] sm:$0xff] %vm421_vm0, %v2005_v63  ;;  %v2006_v22 = vadd.f32 %v3273_v27, %v1972_v56  ;;  %v2025_v10 = vmax.f32 %v2017_v15, 0.0  ;;  %v2119_v56 = vunpack.c.h.bf16 %v2439_v62 }
 0x473   :  { %1961 = vst.msk [vmem:[#allocation2 + $0x30] sm:$0xff] %vm421_vm0, %v1954_v20  ;;  %v1973_v40 = vld [vmem:[#allocation2 + $0x20] sm:$0xff]  ;;  %v2018_v26 = vld [vmem:[#allocation2 + $0x8] sm:$0xff]  ;;  %p2469_p11 = por %p2468_p10, %p2467_p9 }
 0x474   :  { %2013 = vst.msk [vmem:[#allocation2 + $0x18] sm:$0xff] %vm421_vm0, %v2006_v22  ;;  %v2007_v16 = vadd.f32 %v3276_v1, %v1973_v40  ;;  %v2026_v39 = vmax.f32 %v2018_v26, 0.0 }
 0x475   :  { %v1974_v53 = vld [vmem:[#allocation2 + $0x28] sm:$0xff]  ;;  %p2470_p12 = pnand %p2469_p11, %p2463_p8 }
 0x476   :  { %2014 = vst.msk [vmem:[#allocation2 + $0x20] sm:$0xff] %vm421_vm0, %v2007_v16  ;;  %v2008_v31 = vadd.f32 %v3270_v23, %v1974_v53  ;;  %v2033_v28 = vpack.c.bf16 %v2026_v39, %v2025_v10 }
 0x477   :  { %v1849_v41 = vld [vmem:[#allocation2 + $0x38] sm:$0x1] }
 0x478   :  { %2015 = vst.msk [vmem:[#allocation2 + $0x28] sm:$0xff] %vm421_vm0, %v2008_v31  ;;  %v1904_v27 = vadd.f32 %v1888_v34, %v1849_v41  ;;  %2375 = vmatprep.mubr.msk.bf16.mxu0 %vm421_vm0, %v2033_v28 }
 0x479   :  { %v2019_v17 = vld [vmem:[#allocation2 + $0x10] sm:$0xff] }
 0x47a   :  { %v1975_v35 = vld [vmem:[#allocation2 + $0x30] sm:$0x7f]  ;;  %1912 = vst.msk [vmem:[#allocation2 + $0x38] sm:$0x1] %vm794_vm5, %v1904_v27  ;;  %v2027_v48 = vmax.f32 %v2019_v17, 0.0 }
 0x47b   :  { %v2009_v1 = vadd.f32 %v1994_v46, %v1975_v35  ;;  %v2020_v32 = vld [vmem:[#allocation2 + $0x18] sm:$0xff] }
 0x47c   :  { %v2028_v23 = vmax.f32 %v2020_v32, 0.0 }
 0x47d   :  { %2016 = vst.msk [vmem:[#allocation2 + $0x30] sm:$0x7f] %vm648_vm4, %v2009_v1  ;;  %v2021_v50 = vld [vmem:[#allocation2 + $0x20] sm:$0xff] }
 0x47e   :  { %v2034_v30 = vpack.c.bf16 %v2028_v23, %v2027_v48  ;;  %v2029_v38 = vmax.f32 %v2021_v50, 0.0 }
 0x47f   :  { %v2022_v43 = vld [vmem:[#allocation2 + $0x28] sm:$0xff] }
 0x480   :  { %2376 = vmatmul.mubr.msk.bf16.vlgmr.msra.gmra.mrb[32].mxu0 %vm421_vm0, %v2034_v30  ;;  %v2030_v12 = vmax.f32 %v2022_v43, 0.0 }
 0x481   :  { %v2024_v51 = vld [vmem:[#allocation2 + $0x38] sm:$0xff] }
 0x482   :  { %v2035_v45 = vpack.c.bf16 %v2030_v12, %v2029_v38  ;;  %v2032_v46 = vmax.f32 %v2024_v51, 0.0 }
 0x484   :  { %v2023_v52 = vld [vmem:[#allocation2 + $0x30] sm:$0xff]  ;;  %2379 = vmatprep.mubr.msk.bf16.mxu0 %vm421_vm0, %v2035_v45 }
 0x485   :  { %v2031_v47 = vmax.f32 %v2023_v52, 0.0 }
 0x487   :  { %v2036_v57 = vpack.c.bf16 %v2032_v46, %v2031_v47 }
 0x489   :  { %2380 = vmatmul.mubr.msk.bf16.gmra.mrb[36].mxu0 %vm421_vm0, %v2036_v57 }
 0x553   :  { %v2377_v25 = vpop.f32.mrb[32].mxu0 }
 0x554   :  { %v2092_v37 = vadd.f32 %v2377_v25, %v3281_v55  ;;  %v2083_v44 = vpop.f32.mrb[33].mxu0 }
 0x555   :  { %v2084_v58 = vadd.f32 %v3281_v55, %v2083_v44  ;;  %v2378_v60 = vpop.f32.mrb[34].mxu0 }
 0x556   :  { %v2124_v36 = vadd.f32 %v2116_v24, %v2092_v37  ;;  %v2095_v2 = vadd.f32 %v2378_v60, %v3281_v55  ;;  %v2086_v13 = vpop.f32.mrb[35].mxu0 }
 0x557   :  { %v2122_v59 = vadd.f32 %v2114_v29, %v2084_v58  ;;  %v2087_v7 = vadd.f32 %v3281_v55, %v2086_v13 }
 0x558   :  { %v2132_v6 = vmax.f32 %v2124_v36, 0.0  ;;  %v2125_v5 = vadd.f32 %v2117_v49, %v2095_v2 }
 0x559   :  { %v2130_v14 = vmax.f32 %v2122_v59, 0.0  ;;  %v2123_v19 = vadd.f32 %v2115_v0, %v2087_v7 }
 0x55a   :  { %2141 = vst [vmem:[#allocation6 + $0x50] sm:$0xff] %v2132_v6  ;;  %v2133_v21 = vmax.f32 %v2125_v5, 0.0 }
 0x55b   :  { %2139 = vst [vmem:[#allocation6 + $0x40] sm:$0xff] %v2130_v14  ;;  %v2131_v42 = vmax.f32 %v2123_v19, 0.0 }
 0x55c   :  { %v2381_v8 = vpop.f32.mrb[36].mxu0  ;;  %2142 = vst [vmem:[#allocation6 + $0x58] sm:$0xff] %v2133_v21 }
 0x55d   :  { %v2108_v4 = vadd.f32 %v2381_v8, %v3281_v55  ;;  %v2099_v61 = vpop.f32.mrb[37].mxu0  ;;  %2140 = vst [vmem:[#allocation6 + $0x48] sm:$0xff] %v2131_v42 }
 0x55e   :  { %v2100_v63 = vadd.f32 %v3281_v55, %v2099_v61  ;;  %v2382_v20 = vpop.f32.mrb[38].mxu0 }
 0x55f   :  { %v2128_v15 = vadd.f32 %v2120_v11, %v2108_v4  ;;  %v2111_v22 = vadd.f32 %v2382_v20, %v3281_v55  ;;  %v2102_v40 = vpop.f32.mrb[39].mxu0 }
 0x560   :  { %v2126_v26 = vadd.f32 %v2118_v33, %v2100_v63  ;;  %v2103_v16 = vadd.f32 %v3281_v55, %v2102_v40 }
 0x561   :  { %v2136_v10 = vmax.f32 %v2128_v15, 0.0  ;;  %v2129_v39 = vadd.f32 %v2121_v3, %v2111_v22 }
 0x562   :  { %v2134_v53 = vmax.f32 %v2126_v26, 0.0  ;;  %v2127_v31 = vadd.f32 %v2119_v56, %v2103_v16 }
 0x563   :  { %2145 = vst [vmem:[#allocation6 + $0x70] sm:$0xff] %v2136_v10  ;;  %v2137_v28 = vmax.f32 %v2129_v39, 0.0 }
 0x564   :  { %2143 = vst [vmem:[#allocation6 + $0x60] sm:$0xff] %v2134_v53  ;;  %v2135_v34 = vmax.f32 %v2127_v31, 0.0 }
 0x565   :  { %2146 = vst [vmem:[#allocation6 + $0x78] sm:$0xff] %v2137_v28 }
 0x566   :  { %2144 = vst [vmem:[#allocation6 + $0x68] sm:$0xff] %v2135_v34 }
 0x567   :  { %2473 = shalt.err (!%p2470_p12)
}
 0x568   :  { %s2474_s26 = scalar_lea.hbm %s3631_s7, 2048 }
 0x569   :  { %p2475_p13 = scmp.ne.s32.totalorder %s3631_s7, %s2474_s26  ;;  %p2478_p0 = scmp.lt.u32.totalorder %s2474_s26, %s3631_s7 }
 0x56b   :  { %p2480_p1 = pnand %p2478_p0, %p2475_p13 }
 0x56d   :  { %2483 = shalt.err (!%p2480_p1)
}
 0x56e   :  { %s2497_s5 = smov 128   ;;  %s2498_s8 = smov 8  }
 0x56f   :  { %2158 = dma.vmem_to_hbm [thread:$0]  %s2153_s22, 2048, %s3631_s7, [#allocation5], %s2497_s5, %s2497_s5, %s2498_s8  }
 0x570   :  { %2486 = dma.done.wait [#allocation5], 2048  }
 0x571   :  { %2487 = vsyncadd [#allocation5], 4294965248 }
 0x572   :  { %2162 = vsyncpa [#allocation4], 1 }
 0x573   :  { %2163 = vsyncpa [#allocation5], 1 }

</bundles_post_ra>
